<compile_context>
chip_gen: v7x
topology: tpu7x:2x2x1
jax: 0.10.0
libtpu: 0.0.40
codegen_flags: <defaults>
</compile_context>

<pallas_src>
import jax
import jax.numpy as jnp
from jax.experimental import pallas as pl
from jax.experimental.pallas import tpu as pltpu

CONV_OUT = 24
KSIZE = 5


# ----------------------------- Pallas kernels ------------------------------

def conv_pool_kernel(cols_ref, w_ref, b_ref, o_ref):
    # cols_ref: (4, G, 196, C*25) bf16 -- leading axis = 2x2 pool phase (qh*2+qw)
    # w_ref:    (C*25, 24) bf16
    # b_ref:    (1, 24)    f32
    # o_ref:    (G, 196, 24) bf16 -- rows ordered (h', w'), lanes = conv channels
    w = w_ref[...]
    b = b_ref[...]
    n_img = o_ref.shape[0]
    for g in range(n_img):
        # conv-as-matmul per pool phase; ReLU/max commute and bias is shared,
        # so relu(maxpool(conv + b)) == relu(max_q(conv_q) + b).
        m = jnp.dot(cols_ref[0, g], w, preferred_element_type=jnp.float32)
        for q in range(1, 4):
            m = jnp.maximum(m, jnp.dot(cols_ref[q, g], w,
                                       preferred_element_type=jnp.float32))
        o_ref[g] = jnp.maximum(m + b, 0.0).astype(o_ref.dtype)


def mlp_kernel(x_ref, w1_ref, b1_ref, w3_ref, b3_ref, o_ref):
    # x: (B, 4704) bf16 -> fc1 -> ReLU -> fc3 -> (B, num_classes) f32
    h = jnp.dot(x_ref[...], w1_ref[...], preferred_element_type=jnp.float32) + b1_ref[...]
    h = jnp.maximum(h, 0.0).astype(jnp.bfloat16)
    o_ref[...] = jnp.dot(h, w3_ref[...], preferred_element_type=jnp.float32) + b3_ref[...]


# ------------------------------ wrappers ------------------------------------

def _images_per_step(batch):
    # Biggest group that divides the batch while keeping >=2 grid steps (v7x has 2 TCs),
    # capped at 8 images (<~1 MB of cols per buffer -> safe on v7x's smaller VMEM).
    for g in (8, 4, 2, 1):
        if batch % g == 0 and batch // g >= 2:
            return g
    return batch


def conv_pool(cols, wmat, bias):
    _, batch, s, f = cols.shape
    c_out = wmat.shape[1]
    g = _images_per_step(batch)
    return pl.pallas_call(
        conv_pool_kernel,
        out_shape=jax.ShapeDtypeStruct((batch, s, c_out), jnp.bfloat16),
        grid=(batch // g,),
        in_specs=[
            pl.BlockSpec((4, g, s, f), lambda i: (0, i, 0, 0)),
            pl.BlockSpec((f, c_out), lambda i: (0, 0)),
            pl.BlockSpec((1, c_out), lambda i: (0, 0)),
        ],
        out_specs=pl.BlockSpec((g, s, c_out), lambda i: (i, 0, 0)),
        compiler_params=pltpu.CompilerParams(dimension_semantics=("parallel",)),
    )(cols, wmat, bias)


def mlp(feat, w1, b1, w3, b3):
    batch, d = feat.shape
    hidden, k = w1.shape[1], w3.shape[1]
    # Single grid step: w1 (1.1 MB bf16) dominates and is reused across the whole (small)
    # batch; splitting the batch would re-read it per step for no compute benefit.
    return pl.pallas_call(
        mlp_kernel,
        out_shape=jax.ShapeDtypeStruct((batch, k), jnp.float32),
        grid=(1,),
        in_specs=[
            pl.BlockSpec((batch, d), lambda i: (0, 0)),
            pl.BlockSpec((d, hidden), lambda i: (0, 0)),
            pl.BlockSpec((1, hidden), lambda i: (0, 0)),
            pl.BlockSpec((hidden, k), lambda i: (0, 0)),
            pl.BlockSpec((1, k), lambda i: (0, 0)),
        ],
        out_specs=pl.BlockSpec((batch, k), lambda i: (0, 0)),
    )(feat, w1, b1, w3, b3)


# ------------------------- parameter preprocessing ---------------------------

def prepare_params(params):
    """One-time host-side parameter prep (hoisted out of the per-forward path)."""
    conv_w, conv_b, w1, b1, w3, b3 = params
    co, c = conv_w.shape[0], conv_w.shape[1]
    ph = pw = 14
    # conv weight as a (C*25, 24) matmul operand; feature order c*25 + kh*5 + kw.
    wmat = conv_w.reshape(co, c * KSIZE * KSIZE).T.astype(jnp.bfloat16)
    # Permute fc1 rows from torch's NCHW-flatten order (c, h', w') to the kernel's
    # (h', w', c) order, so no per-forward flatten transpose is needed.
    w1p = (w1.reshape(co, ph * pw, w1.shape[1])
             .transpose(1, 0, 2)
             .reshape(co * ph * pw, w1.shape[1])
             .astype(jnp.bfloat16))
    return (wmat, conv_b.reshape(1, co).astype(jnp.float32),
            w1p, b1.reshape(1, -1).astype(jnp.float32),
            w3.astype(jnp.bfloat16), b3.reshape(1, -1).astype(jnp.float32))


# ------------------------------ full forward --------------------------------

@jax.jit
def model_forward(x, prepared):
    """x: (B, C, 32, 32) NCHW float32, matching the PyTorch module."""
    wmat, conv_b, w1p, b1, w3, b3 = prepared
    batch, c, h, w = x.shape
    oh, ow = h - KSIZE + 1, w - KSIZE + 1          # 28, 28
    ph, pw = oh // 2, ow // 2                      # 14, 14

    # ---- glue: im2col grouped by 2x2 pool phase -> (4, B, 196, C*25), bf16
    # TODO(synk): im2col is still materialized by XLA; could be moved in-kernel via manual DMA.
    patches = jnp.stack([x[:, :, kh:kh + oh, kw:kw + ow]
                         for kh in range(KSIZE) for kw in range(KSIZE)], axis=2)
    cols = patches.reshape(batch, c, KSIZE * KSIZE, ph, 2, pw, 2)
    cols = cols.transpose(4, 6, 0, 3, 5, 1, 2)     # (qh, qw, b, h', w', c, k)
    cols = cols.reshape(4, batch, ph * pw, c * KSIZE * KSIZE).astype(jnp.bfloat16)

    # ---- Pallas: conv + bias + ReLU + 2x2 maxpool, fused -> (B, 196, 24) bf16
    pooled = conv_pool(cols, wmat, conv_b)

    # TODO(synk): nn.Dropout(0.1) is identity in eval mode; training-mode RNG mask not implemented.

    # ---- free row-major reshape; fc1 weights were pre-permuted to this (h', w', c) order
    feat = pooled.reshape(batch, ph * pw * CONV_OUT)

    # ---- Pallas: fc1 + ReLU + fc3
    return mlp(feat, w1p, b1, w3, b3)


# ------------------------------ test harness --------------------------------

def init_params(key, num_channels, num_classes):
    ks = jax.random.split(key, 6)
    conv_w = jax.random.normal(ks[0], (24, num_channels, 5, 5), jnp.float32) * 0.05
    conv_b = jax.random.normal(ks[1], (24,), jnp.float32) * 0.05
    w1 = jax.random.normal(ks[2], (4704, 120), jnp.float32) * 0.02
    b1 = jax.random.normal(ks[3], (120,), jnp.float32) * 0.02
    w3 = jax.random.normal(ks[4], (120, num_classes), jnp.float32) * 0.05
    b3 = jax.random.normal(ks[5], (num_classes,), jnp.float32) * 0.05
    return conv_w, conv_b, w1, b1, w3, b3


def reference_forward(x, params):
    """Pure-JAX f32 reference replicating the PyTorch forward (eval mode)."""
    conv_w, conv_b, w1, b1, w3, b3 = params
    y = jax.lax.conv_general_dilated(x, conv_w, (1, 1), "VALID",
                                     dimension_numbers=("NCHW", "OIHW", "NCHW"))
    y = jax.nn.relu(y + conv_b[None, :, None, None])
    batch = x.shape[0]
    y = y.reshape(batch, 24, 14, 2, 14, 2).max(axis=(3, 5))
    y = y.reshape(batch, -1)
    y = jax.nn.relu(y @ w1 + b1)
    return y @ w3 + b3


if __name__ == "__main__":
    num_channels, num_classes = 3, 10
    key = jax.random.PRNGKey(0)
    kx, kp = jax.random.split(key)
    # fc1 expects 4704 = 24*14*14 features -> input spatial size must be 32x32
    x = jax.random.normal(kx, (2, num_channels, 32, 32), jnp.float32)
    params = init_params(kp, num_channels, num_classes)
    prepared = prepare_params(params)

    out = jax.block_until_ready(model_forward(x, prepared))
    assert out.shape == (2, num_classes), out.shape

    ref = jax.block_until_ready(reference_forward(x, params))
    # bf16 matmul operands with f32 accumulation -> ~1e-3 level error; 3e-2 is ample.
    assert jnp.allclose(out, ref, atol=3e-2, rtol=3e-2), float(jnp.max(jnp.abs(out - ref)))

    print("KERNEL_OK")
</pallas_src>

<mosaic_0001>
module attributes {stable_mosaic.version = 11 : i64} {
  func.func @conv_pool_kernel(%arg0: i32, %arg1: memref<4x1x196x75xbf16, #tpu.memory_space<vmem>>, %arg2: memref<75x24xbf16, #tpu.memory_space<vmem>>, %arg3: memref<1x24xf32, #tpu.memory_space<vmem>>, %arg4: memref<1x196x24xbf16, #tpu.memory_space<vmem>>) attributes {dimension_semantics = [#tpu.dimension_semantics<parallel>], iteration_bounds = array<i64: 2>, scalar_prefetch = 0 : i64, scratch_operands = 0 : i64, tpu.core_type = #tpu.core_type<tc>, window_params = [{transform_indices = @transform_0, window_bounds = array<i64: 4, 1, 196, 75>}, {pipeline_mode = #tpu.pipeline_mode<synchronous>, transform_indices = @transform_1, window_bounds = array<i64: 75, 24>}, {pipeline_mode = #tpu.pipeline_mode<synchronous>, transform_indices = @transform_2, window_bounds = array<i64: 1, 24>}, {transform_indices = @transform_3, window_bounds = array<i64: 1, 196, 24>}]} {
    %c0 = arith.constant 0 : index
    %c0_0 = arith.constant 0 : index
    %0 = vector.load %arg2[%c0, %c0_0] : memref<75x24xbf16, #tpu.memory_space<vmem>>, vector<75x24xbf16>
    %c0_1 = arith.constant 0 : index
    %c0_2 = arith.constant 0 : index
    %1 = vector.load %arg3[%c0_1, %c0_2] : memref<1x24xf32, #tpu.memory_space<vmem>>, vector<1x24xf32>
    %c0_3 = arith.constant 0 : index
    %c0_4 = arith.constant 0 : index
    %c0_5 = arith.constant 0 : index
    %c0_6 = arith.constant 0 : index
    %2 = vector.load %arg1[%c0_3, %c0_4, %c0_5, %c0_6] : memref<4x1x196x75xbf16, #tpu.memory_space<vmem>>, vector<1x1x196x75xbf16>
    %3 = vector.shape_cast %2 : vector<1x1x196x75xbf16> to vector<196x75xbf16>
    %cst = arith.constant dense<0.000000e+00> : vector<196x24xf32>
    %4 = tpu.matmul %3, %0, %cst {dimension_numbers = #tpu.dot_dimension_numbers<[1], [0], [0], [1], [0, 0, 1, 1], [], []>} : vector<196x75xbf16>, vector<75x24xbf16>, vector<196x24xf32> -> vector<196x24xf32>
    %c1 = arith.constant 1 : index
    %c0_7 = arith.constant 0 : index
    %c0_8 = arith.constant 0 : index
    %c0_9 = arith.constant 0 : index
    %5 = vector.load %arg1[%c1, %c0_7, %c0_8, %c0_9] : memref<4x1x196x75xbf16, #tpu.memory_space<vmem>>, vector<1x1x196x75xbf16>
    %6 = vector.shape_cast %5 : vector<1x1x196x75xbf16> to vector<196x75xbf16>
    %cst_10 = arith.constant dense<0.000000e+00> : vector<196x24xf32>
    %7 = tpu.matmul %6, %0, %cst_10 {dimension_numbers = #tpu.dot_dimension_numbers<[1], [0], [0], [1], [0, 0, 1, 1], [], []>} : vector<196x75xbf16>, vector<75x24xbf16>, vector<196x24xf32> -> vector<196x24xf32>
    %8 = arith.maximumf %4, %7 : vector<196x24xf32>
    %c2 = arith.constant 2 : index
    %c0_11 = arith.constant 0 : index
    %c0_12 = arith.constant 0 : index
    %c0_13 = arith.constant 0 : index
    %9 = vector.load %arg1[%c2, %c0_11, %c0_12, %c0_13] : memref<4x1x196x75xbf16, #tpu.memory_space<vmem>>, vector<1x1x196x75xbf16>
    %10 = vector.shape_cast %9 : vector<1x1x196x75xbf16> to vector<196x75xbf16>
    %cst_14 = arith.constant dense<0.000000e+00> : vector<196x24xf32>
    %11 = tpu.matmul %10, %0, %cst_14 {dimension_numbers = #tpu.dot_dimension_numbers<[1], [0], [0], [1], [0, 0, 1, 1], [], []>} : vector<196x75xbf16>, vector<75x24xbf16>, vector<196x24xf32> -> vector<196x24xf32>
    %12 = arith.maximumf %8, %11 : vector<196x24xf32>
    %c3 = arith.constant 3 : index
    %c0_15 = arith.constant 0 : index
    %c0_16 = arith.constant 0 : index
    %c0_17 = arith.constant 0 : index
    %13 = vector.load %arg1[%c3, %c0_15, %c0_16, %c0_17] : memref<4x1x196x75xbf16, #tpu.memory_space<vmem>>, vector<1x1x196x75xbf16>
    %14 = vector.shape_cast %13 : vector<1x1x196x75xbf16> to vector<196x75xbf16>
    %cst_18 = arith.constant dense<0.000000e+00> : vector<196x24xf32>
    %15 = tpu.matmul %14, %0, %cst_18 {dimension_numbers = #tpu.dot_dimension_numbers<[1], [0], [0], [1], [0, 0, 1, 1], [], []>} : vector<196x75xbf16>, vector<75x24xbf16>, vector<196x24xf32> -> vector<196x24xf32>
    %16 = arith.maximumf %12, %15 : vector<196x24xf32>
    %17 = vector.broadcast %1 : vector<1x24xf32> to vector<196x24xf32>
    %18 = arith.addf %16, %17 : vector<196x24xf32>
    %cst_19 = arith.constant 0.000000e+00 : f32
    %19 = vector.broadcast %cst_19 : f32 to vector<196x24xf32>
    %20 = arith.maximumf %18, %19 : vector<196x24xf32>
    %21 = arith.truncf %20 : vector<196x24xf32> to vector<196x24xbf16>
    %c0_20 = arith.constant 0 : index
    %c0_21 = arith.constant 0 : index
    %c0_22 = arith.constant 0 : index
    %22 = vector.load %arg4[%c0_20, %c0_21, %c0_22] : memref<1x196x24xbf16, #tpu.memory_space<vmem>>, vector<1x196x24xbf16>
    %23 = vector.shape_cast %22 : vector<1x196x24xbf16> to vector<196x24xbf16>
    %24 = vector.shape_cast %21 : vector<196x24xbf16> to vector<1x196x24xbf16>
    tpu.vector_store %arg4[%c0_20, %c0_21, %c0_22], %24 {strides = array<i32>} : memref<1x196x24xbf16, #tpu.memory_space<vmem>>, vector<1x196x24xbf16>,
    return
  }
  func.func @transform_0(%arg0: i32) -> (i32, i32, i32, i32) {
    %c0_i32 = arith.constant 0 : i32
    %c0_i32_0 = arith.constant 0 : i32
    %c0_i32_1 = arith.constant 0 : i32
    %c0_i32_2 = arith.constant 0 : i32
    return %c0_i32, %arg0, %c0_i32_0, %c0_i32_1 : i32, i32, i32, i32
  }
  func.func @transform_1(%arg0: i32) -> (i32, i32) {
    %c0_i32 = arith.constant 0 : i32
    %c0_i32_0 = arith.constant 0 : i32
    %c0_i32_1 = arith.constant 0 : i32
    return %c0_i32, %c0_i32_0 : i32, i32
  }
  func.func @transform_2(%arg0: i32) -> (i32, i32) {
    %c0_i32 = arith.constant 0 : i32
    %c0_i32_0 = arith.constant 0 : i32
    %c0_i32_1 = arith.constant 0 : i32
    return %c0_i32, %c0_i32_0 : i32, i32
  }
  func.func @transform_3(%arg0: i32) -> (i32, i32, i32) {
    %c0_i32 = arith.constant 0 : i32
    %c0_i32_0 = arith.constant 0 : i32
    %c0_i32_1 = arith.constant 0 : i32
    return %arg0, %c0_i32, %c0_i32_0 : i32, i32, i32
  }
}

module attributes {stable_mosaic.version = 11 : i64} {
  func.func @mlp_kernel(%arg0: i32, %arg1: memref<2x4704xbf16, #tpu.memory_space<vmem>>, %arg2: memref<4704x120xbf16, #tpu.memory_space<vmem>>, %arg3: memref<1x120xf32, #tpu.memory_space<vmem>>, %arg4: memref<120x10xbf16, #tpu.memory_space<vmem>>, %arg5: memref<1x10xf32, #tpu.memory_space<vmem>>, %arg6: memref<2x10xf32, #tpu.memory_space<vmem>>) attributes {dimension_semantics = [#tpu.dimension_semantics<arbitrary>], iteration_bounds = array<i64: 1>, scalar_prefetch = 0 : i64, scratch_operands = 0 : i64, tpu.core_type = #tpu.core_type<tc>, window_params = [{pipeline_mode = #tpu.pipeline_mode<synchronous>, transform_indices = @transform_0, window_bounds = array<i64: 2, 4704>}, {pipeline_mode = #tpu.pipeline_mode<synchronous>, transform_indices = @transform_1, window_bounds = array<i64: 4704, 120>}, {pipeline_mode = #tpu.pipeline_mode<synchronous>, transform_indices = @transform_2, window_bounds = array<i64: 1, 120>}, {pipeline_mode = #tpu.pipeline_mode<synchronous>, transform_indices = @transform_3, window_bounds = array<i64: 120, 10>}, {pipeline_mode = #tpu.pipeline_mode<synchronous>, transform_indices = @transform_4, window_bounds = array<i64: 1, 10>}, {pipeline_mode = #tpu.pipeline_mode<synchronous>, transform_indices = @transform_5, window_bounds = array<i64: 2, 10>}]} {
    %c0 = arith.constant 0 : index
    %c0_0 = arith.constant 0 : index
    %0 = vector.load %arg1[%c0, %c0_0] : memref<2x4704xbf16, #tpu.memory_space<vmem>>, vector<2x4704xbf16>
    %c0_1 = arith.constant 0 : index
    %c0_2 = arith.constant 0 : index
    %1 = vector.load %arg2[%c0_1, %c0_2] : memref<4704x120xbf16, #tpu.memory_space<vmem>>, vector<4704x120xbf16>
    %cst = arith.constant dense<0.000000e+00> : vector<2x120xf32>
    %2 = tpu.matmul %0, %1, %cst {dimension_numbers = #tpu.dot_dimension_numbers<[1], [0], [0], [1], [0, 0, 1, 1], [], []>} : vector<2x4704xbf16>, vector<4704x120xbf16>, vector<2x120xf32> -> vector<2x120xf32>
    %c0_3 = arith.constant 0 : index
    %c0_4 = arith.constant 0 : index
    %3 = vector.load %arg3[%c0_3, %c0_4] : memref<1x120xf32, #tpu.memory_space<vmem>>, vector<1x120xf32>
    %4 = vector.broadcast %3 : vector<1x120xf32> to vector<2x120xf32>
    %5 = arith.addf %2, %4 : vector<2x120xf32>
    %cst_5 = arith.constant 0.000000e+00 : f32
    %6 = vector.broadcast %cst_5 : f32 to vector<2x120xf32>
    %7 = arith.maximumf %5, %6 : vector<2x120xf32>
    %8 = arith.truncf %7 : vector<2x120xf32> to vector<2x120xbf16>
    %c0_6 = arith.constant 0 : index
    %c0_7 = arith.constant 0 : index
    %9 = vector.load %arg4[%c0_6, %c0_7] : memref<120x10xbf16, #tpu.memory_space<vmem>>, vector<120x10xbf16>
    %cst_8 = arith.constant dense<0.000000e+00> : vector<2x10xf32>
    %10 = tpu.matmul %8, %9, %cst_8 {dimension_numbers = #tpu.dot_dimension_numbers<[1], [0], [0], [1], [0, 0, 1, 1], [], []>} : vector<2x120xbf16>, vector<120x10xbf16>, vector<2x10xf32> -> vector<2x10xf32>
    %c0_9 = arith.constant 0 : index
    %c0_10 = arith.constant 0 : index
    %11 = vector.load %arg5[%c0_9, %c0_10] : memref<1x10xf32, #tpu.memory_space<vmem>>, vector<1x10xf32>
    %12 = vector.broadcast %11 : vector<1x10xf32> to vector<2x10xf32>
    %13 = arith.addf %10, %12 : vector<2x10xf32>
    %c0_11 = arith.constant 0 : index
    %c0_12 = arith.constant 0 : index
    %14 = vector.load %arg6[%c0_11, %c0_12] : memref<2x10xf32, #tpu.memory_space<vmem>>, vector<2x10xf32>
    tpu.vector_store %arg6[%c0_11, %c0_12], %13 {strides = array<i32>} : memref<2x10xf32, #tpu.memory_space<vmem>>, vector<2x10xf32>,
    return
  }
  func.func @transform_0(%arg0: i32) -> (i32, i32) {
    %c0_i32 = arith.constant 0 : i32
    %c0_i32_0 = arith.constant 0 : i32
    %c0_i32_1 = arith.constant 0 : i32
    return %c0_i32, %c0_i32_0 : i32, i32
  }
  func.func @transform_1(%arg0: i32) -> (i32, i32) {
    %c0_i32 = arith.constant 0 : i32
    %c0_i32_0 = arith.constant 0 : i32
    %c0_i32_1 = arith.constant 0 : i32
    return %c0_i32, %c0_i32_0 : i32, i32
  }
  func.func @transform_2(%arg0: i32) -> (i32, i32) {
    %c0_i32 = arith.constant 0 : i32
    %c0_i32_0 = arith.constant 0 : i32
    %c0_i32_1 = arith.constant 0 : i32
    return %c0_i32, %c0_i32_0 : i32, i32
  }
  func.func @transform_3(%arg0: i32) -> (i32, i32) {
    %c0_i32 = arith.constant 0 : i32
    %c0_i32_0 = arith.constant 0 : i32
    %c0_i32_1 = arith.constant 0 : i32
    return %c0_i32, %c0_i32_0 : i32, i32
  }
  func.func @transform_4(%arg0: i32) -> (i32, i32) {
    %c0_i32 = arith.constant 0 : i32
    %c0_i32_0 = arith.constant 0 : i32
    %c0_i32_1 = arith.constant 0 : i32
    return %c0_i32, %c0_i32_0 : i32, i32
  }
  func.func @transform_5(%arg0: i32) -> (i32, i32) {
    %c0_i32 = arith.constant 0 : i32
    %c0_i32_0 = arith.constant 0 : i32
    %c0_i32_1 = arith.constant 0 : i32
    return %c0_i32, %c0_i32_0 : i32, i32
  }
}

</mosaic_0001>

<bundles_post_ra>
// kernel: model_forward.2
= control target key start
LH: loop header
LB: loop body
LE: loop exit
PB: predicated region body
PF: predicated region fallthrough
CT: control target
= control target key end

     0   :  { %s2732_s12 = smov 0   ;;  %s2734_s13 = smov 0   ;;  %s3445_s0 = inlined_call_operand.vmem [shape: bf16[4,2,196,75], index: 0, kind: input, shape index: {}]   ;;  %s3446_s1 = inlined_call_operand.vmem [shape: bf16[75,24], index: 1, kind: input, shape index: {}]   ;;  %s3447_s2 = inlined_call_operand.vmem [shape: f32[1,24], index: 2, kind: input, shape index: {}]   ;;  %s3448_s3 = inlined_call_operand.vmem [shape: bf16[2,196,24], index: 3, kind: output, shape index: {}]  }
   0x1   :  { %s2736_s14 = smov 0  }
   0x2 LB: > { %s2033_s15 = sadd.s32 4294967295, %s2707_s14   ;;  %s2749_s16 = sadd.s32 1, %s2707_s14   ;;  %s2707_s14 = sphi %s2736_s14, %s3474_s14   ;;  %s2703_s13 = sphi %s2734_s13, %s3473_s13   ;;  %s2699_s12 = sphi %s2732_s12, %s3472_s12  }
   0x3   : > { %s17_s17 = ssub.s32 %s2707_s14, %s2749_s16  ;;  %s20_s18 = sadd.s32 1, %s2703_s13 }
   0x4   : > { %p18_p0 = scmp.eq.s32.totalorder %s17_s17, 0  ;;  %p27_p1 = scmp.ne.s32.totalorder %s2703_s13, %s2699_s12 }
   0x5   : > { %p28_p2 = scmp.eq.s32.totalorder %s2707_s14, 0  ;;  %p2036_p4 = scmp.ge.s32.totalorder %s2707_s14, 2 }
   0x6   : > { %s2758_s19 = scalar_select %p18_p0, %s2703_s13, %s20_s18  }
   0x7   : > { %p29_p3 = por %p28_p2, %p27_p1  ;;  %127 = sbr.rel (%p2036_p4) target bundleno = 45 (0x2d), region = 24 }
   0xe   : > { %130 = sbr.rel (!%p29_p3) target bundleno = 45 (0x2d), region = 28  ;;  %s132_s20 = sand.u32 (%p29_p3), 1, %s2703_s13  }
   0xf   : > { %s2598_s21 = smul.u32 (%p29_p3), 100, %s2707_s14 }
  0x10   : > { %s2597_s22 = smul.u32 (%p29_p3), 400, %s132_s20 }
  0x11   : > { %s2766_s25 = scalar_lea.vmem (%p29_p3), %s3445_s0, %s2598_s21 }
  0x12   : > { %v153_v0 = vld [vmem:[%s2766_s25] sm:$0xff] (%p29_p3)   ;;  %v157_v1 = vld [vmem:[%s2766_s25 + $0x8] sm:$0xff] (%p29_p3)   ;;  %v161_v2 = vld [vmem:[%s2766_s25 + $0x10] sm:$0xff] (%p29_p3)   ;;  %s2771_s26 = scalar_lea.vmem (%p29_p3), [#allocation2], %s2597_s22 }
  0x13   : > { %154 = vst [vmem:[%s2771_s26] sm:$0xff] (%p29_p3), %v153_v0   ;;  %158 = vst [vmem:[%s2771_s26 + $0x8] sm:$0xff] (%p29_p3), %v157_v1   ;;  %v165_v3 = vld [vmem:[%s2766_s25 + $0x18] sm:$0xff] (%p29_p3)   ;;  %v169_v4 = vld [vmem:[%s2766_s25 + $0x20] sm:$0xff] (%p29_p3)  }
  0x14   : > { %162 = vst [vmem:[%s2771_s26 + $0x10] sm:$0xff] (%p29_p3), %v161_v2   ;;  %v173_v5 = vld [vmem:[%s2766_s25 + $0x28] sm:$0xff] (%p29_p3)   ;;  %166 = vst [vmem:[%s2771_s26 + $0x18] sm:$0xff] (%p29_p3), %v165_v3   ;;  %v177_v6 = vld [vmem:[%s2766_s25 + $0x30] sm:$0xff] (%p29_p3)  }
  0x15   : > { %170 = vst [vmem:[%s2771_s26 + $0x20] sm:$0xff] %v169_v4   ;;  %174 = vst [vmem:[%s2771_s26 + $0x28] sm:$0xff] %v173_v5   ;;  %v181_v7 = vld [vmem:[%s2766_s25 + $0x38] sm:$0xff]   ;;  %v185_v8 = vld [vmem:[%s2766_s25 + $0x40] sm:$0xff]  }
  0x16   : > { %178 = vst [vmem:[%s2771_s26 + $0x30] sm:$0xff] %v177_v6   ;;  %182 = vst [vmem:[%s2771_s26 + $0x38] sm:$0xff] %v181_v7   ;;  %v189_v9 = vld [vmem:[%s2766_s25 + $0x48] sm:$0xff]   ;;  %v193_v10 = vld [vmem:[%s2766_s25 + $0x50] sm:$0xff]  }
  0x17   : > { %186 = vst [vmem:[%s2771_s26 + $0x40] sm:$0xff] %v185_v8   ;;  %v197_v11 = vld [vmem:[%s2766_s25 + $0x58] sm:$0xff]   ;;  %190 = vst [vmem:[%s2771_s26 + $0x48] sm:$0xff] %v189_v9   ;;  %v201_v12 = vld [vmem:[%s2766_s25 + $0x60] sm:$0xf] }
  0x18   : > { %194 = vst [vmem:[%s2771_s26 + $0x50] sm:$0xff] %v193_v10   ;;  %198 = vst [vmem:[%s2771_s26 + $0x58] sm:$0xff] %v197_v11   ;;  %v203_v13 = vld [vmem:[%s2766_s25 + $0xc8] sm:$0xff]   ;;  %v207_v14 = vld [vmem:[%s2766_s25 + $0xd0] sm:$0xff]  }
  0x19   : > { %202 = vst [vmem:[%s2771_s26 + $0x60] sm:$0xf] %v201_v12  ;;  %204 = vst [vmem:[%s2771_s26 + $0x64] sm:$0xff] %v203_v13   ;;  %v211_v15 = vld [vmem:[%s2766_s25 + $0xd8] sm:$0xff]   ;;  %v215_v16 = vld [vmem:[%s2766_s25 + $0xe0] sm:$0xff]  }
  0x1a   : > { %208 = vst [vmem:[%s2771_s26 + $0x6c] sm:$0xff] %v207_v14   ;;  %v219_v17 = vld [vmem:[%s2766_s25 + $0xe8] sm:$0xff]   ;;  %212 = vst [vmem:[%s2771_s26 + $0x74] sm:$0xff] %v211_v15   ;;  %v223_v18 = vld [vmem:[%s2766_s25 + $0xf0] sm:$0xff]  }
  0x1b   : > { %216 = vst [vmem:[%s2771_s26 + $0x7c] sm:$0xff] %v215_v16   ;;  %220 = vst [vmem:[%s2771_s26 + $0x84] sm:$0xff] %v219_v17   ;;  %v227_v19 = vld [vmem:[%s2766_s25 + $0xf8] sm:$0xff]   ;;  %v231_v20 = vld [vmem:[%s2766_s25 + $0x100] sm:$0xff]  }
  0x1c   : > { %224 = vst [vmem:[%s2771_s26 + $0x8c] sm:$0xff] %v223_v18   ;;  %228 = vst [vmem:[%s2771_s26 + $0x94] sm:$0xff] %v227_v19   ;;  %v235_v21 = vld [vmem:[%s2766_s25 + $0x108] sm:$0xff]   ;;  %v239_v22 = vld [vmem:[%s2766_s25 + $0x110] sm:$0xff]  }
  0x1d   : > { %232 = vst [vmem:[%s2771_s26 + $0x9c] sm:$0xff] %v231_v20   ;;  %v243_v23 = vld [vmem:[%s2766_s25 + $0x118] sm:$0xff]   ;;  %236 = vst [vmem:[%s2771_s26 + $0xa4] sm:$0xff] %v235_v21   ;;  %v247_v24 = vld [vmem:[%s2766_s25 + $0x120] sm:$0xff]  }
  0x1e   : > { %240 = vst [vmem:[%s2771_s26 + $0xac] sm:$0xff] %v239_v22   ;;  %244 = vst [vmem:[%s2771_s26 + $0xb4] sm:$0xff] %v243_v23   ;;  %v251_v25 = vld [vmem:[%s2766_s25 + $0x128] sm:$0xf]  ;;  %v253_v26 = vld [vmem:[%s2766_s25 + $0x190] sm:$0xff]  }
  0x1f   : > { %248 = vst [vmem:[%s2771_s26 + $0xbc] sm:$0xff] %v247_v24   ;;  %252 = vst [vmem:[%s2771_s26 + $0xc4] sm:$0xf] %v251_v25  ;;  %v257_v27 = vld [vmem:[%s2766_s25 + $0x198] sm:$0xff]   ;;  %v261_v28 = vld [vmem:[%s2766_s25 + $0x1a0] sm:$0xff]  }
  0x20   : > { %254 = vst [vmem:[%s2771_s26 + $0xc8] sm:$0xff] %v253_v26   ;;  %v265_v29 = vld [vmem:[%s2766_s25 + $0x1a8] sm:$0xff]   ;;  %258 = vst [vmem:[%s2771_s26 + $0xd0] sm:$0xff] %v257_v27   ;;  %v269_v30 = vld [vmem:[%s2766_s25 + $0x1b0] sm:$0xff]  }
  0x21   : > { %262 = vst [vmem:[%s2771_s26 + $0xd8] sm:$0xff] %v261_v28   ;;  %266 = vst [vmem:[%s2771_s26 + $0xe0] sm:$0xff] %v265_v29   ;;  %v273_v31 = vld [vmem:[%s2766_s25 + $0x1b8] sm:$0xff]   ;;  %v277_v32 = vld [vmem:[%s2766_s25 + $0x1c0] sm:$0xff]  }
  0x22   : > { %270 = vst [vmem:[%s2771_s26 + $0xe8] sm:$0xff] %v269_v30   ;;  %274 = vst [vmem:[%s2771_s26 + $0xf0] sm:$0xff] %v273_v31   ;;  %v281_v33 = vld [vmem:[%s2766_s25 + $0x1c8] sm:$0xff]   ;;  %v285_v34 = vld [vmem:[%s2766_s25 + $0x1d0] sm:$0xff]  }
  0x23   : > { %278 = vst [vmem:[%s2771_s26 + $0xf8] sm:$0xff] %v277_v32   ;;  %v289_v35 = vld [vmem:[%s2766_s25 + $0x1d8] sm:$0xff]   ;;  %282 = vst [vmem:[%s2771_s26 + $0x100] sm:$0xff] %v281_v33   ;;  %v293_v36 = vld [vmem:[%s2766_s25 + $0x1e0] sm:$0xff]  }
  0x24   : > { %286 = vst [vmem:[%s2771_s26 + $0x108] sm:$0xff] %v285_v34   ;;  %290 = vst [vmem:[%s2771_s26 + $0x110] sm:$0xff] %v289_v35   ;;  %v297_v37 = vld [vmem:[%s2766_s25 + $0x1e8] sm:$0xff]   ;;  %v301_v38 = vld [vmem:[%s2766_s25 + $0x1f0] sm:$0xf] }
  0x25   : > { %294 = vst [vmem:[%s2771_s26 + $0x118] sm:$0xff] %v293_v36   ;;  %298 = vst [vmem:[%s2771_s26 + $0x120] sm:$0xff] %v297_v37   ;;  %v303_v39 = vld [vmem:[%s2766_s25 + $0x258] sm:$0xff]   ;;  %v307_v40 = vld [vmem:[%s2766_s25 + $0x260] sm:$0xff]  }
  0x26   : > { %302 = vst [vmem:[%s2771_s26 + $0x128] sm:$0xf] %v301_v38  ;;  %v311_v41 = vld [vmem:[%s2766_s25 + $0x268] sm:$0xff]   ;;  %304 = vst [vmem:[%s2771_s26 + $0x12c] sm:$0xff] %v303_v39   ;;  %v315_v42 = vld [vmem:[%s2766_s25 + $0x270] sm:$0xff]  }
  0x27   : > { %308 = vst [vmem:[%s2771_s26 + $0x134] sm:$0xff] %v307_v40   ;;  %312 = vst [vmem:[%s2771_s26 + $0x13c] sm:$0xff] %v311_v41   ;;  %v319_v43 = vld [vmem:[%s2766_s25 + $0x278] sm:$0xff]   ;;  %v323_v44 = vld [vmem:[%s2766_s25 + $0x280] sm:$0xff]  }
  0x28   : > { %316 = vst [vmem:[%s2771_s26 + $0x144] sm:$0xff] %v315_v42   ;;  %320 = vst [vmem:[%s2771_s26 + $0x14c] sm:$0xff] %v319_v43   ;;  %v327_v45 = vld [vmem:[%s2766_s25 + $0x288] sm:$0xff]   ;;  %v331_v46 = vld [vmem:[%s2766_s25 + $0x290] sm:$0xff]  }
  0x29   : > { %324 = vst [vmem:[%s2771_s26 + $0x154] sm:$0xff] %v323_v44   ;;  %v335_v47 = vld [vmem:[%s2766_s25 + $0x298] sm:$0xff]   ;;  %328 = vst [vmem:[%s2771_s26 + $0x15c] sm:$0xff] %v327_v45   ;;  %v339_v48 = vld [vmem:[%s2766_s25 + $0x2a0] sm:$0xff]  }
  0x2a   : > { %332 = vst [vmem:[%s2771_s26 + $0x164] sm:$0xff] %v331_v46   ;;  %336 = vst [vmem:[%s2771_s26 + $0x16c] sm:$0xff] %v335_v47   ;;  %v343_v49 = vld [vmem:[%s2766_s25 + $0x2a8] sm:$0xff]   ;;  %v347_v50 = vld [vmem:[%s2766_s25 + $0x2b0] sm:$0xff]  }
  0x2b   : > { %340 = vst [vmem:[%s2771_s26 + $0x174] sm:$0xff] %v339_v48   ;;  %344 = vst [vmem:[%s2771_s26 + $0x17c] sm:$0xff] %v343_v49   ;;  %v351_v51 = vld [vmem:[%s2766_s25 + $0x2b8] sm:$0xf] }
  0x2c   : > { %348 = vst [vmem:[%s2771_s26 + $0x184] sm:$0xff] %v347_v50   ;;  %352 = vst [vmem:[%s2771_s26 + $0x18c] sm:$0xf] %v351_v51 }
  0x2d PF: > { %p2038_p5 = scmp.ge.s32.totalorder %s2707_s14, 1  ;;  %p574_p6 = scmp.lt.s32.totalorder %s2707_s14, 3 }
  0x2f   : > { %p575_p7 = pnand %p2038_p5, %p574_p6 }
  0x30   : > { %v2628_v52 = vld [vmem:[%s3446_s1] sm:$0xff] (!%p575_p7)   ;;  %v2709_v53 = vmov (!%p575_p7), 0.0   ;;  %v2629_v54 = vld [vmem:[%s3446_s1 + $0x8] sm:$0xff] (!%p575_p7)   ;;  %vm778_vm0 = vcmask (!%p575_p7), 1044480   ;;  %s581_s4 = sand.u32 (!%p575_p7), 1, %s2699_s12   ;;  %v2630_v55 = vld [vmem:[%s3446_s1 + $0x10] sm:$0xff] (!%p575_p7)  }
  0x31   : > { %578 = sbr.rel (%p575_p7) target bundleno = 492 (0x1ec), region = 69  ;;  %2349 = vmatprep.subr.bf16.mxu0 (!%p575_p7), %v2709_v53  ;;  %2411 = vmatprep.subr.bf16.mxu1 (!%p575_p7), %v2709_v53  ;;  %vm779_vm1 = vcmask (!%p575_p7), 1045504   ;;  %v2710_v56 = vmov (!%p575_p7), 65535   ;;  %vm2711_vm2 = vmmov (!%p575_p7), 0   ;;  %v2631_v58 = vld [vmem:[%s3446_s1 + $0x18] sm:$0xff] (!%p575_p7)   ;;  %vm738_vm3 = vcmask (!%p575_p7), 613376  }
  0x32   : > { %2350 = vmatpush3.bf16.msra.mxu0 (!%p575_p7), %v2628_v52  ;;  %2412 = vmatpush3.bf16.msra.mxu1 (!%p575_p7), %v2628_v52  ;;  %s2599_s7 = smul.u32 (!%p575_p7), 400, %s581_s4  ;;  %v780_v57 = vsel (!%p575_p7), %vm778_vm0, 4294967295, %v2710_v56  ;;  %v2632_v59 = vld [vmem:[%s3446_s1 + $0x20] sm:$0x3f] (!%p575_p7)   ;;  %p604_p8 = scmp.lt.s32.totalorder (!%p575_p7), %s2033_s15, 1  ;;  %vm1945_vm4 = vcmask (!%p575_p7), 191488  }
  0x33   : > { %2351 = vmatprep.subr.bf16.mxu0 (!%p575_p7), %v2709_v53  ;;  %2413 = vmatprep.subr.bf16.mxu1 (!%p575_p7), %v2709_v53  ;;  %v781_v60 = vsel (!%p575_p7), %vm779_vm1, %v780_v57, 0  ;;  %vm1970_vm5 = vcmask (!%p575_p7), 189440  }
  0x34   : > { %2359 = vmatprep.mubr.msk.bf16.mxu0 (!%p575_p7), %vm2711_vm2, %v2709_v53  ;;  %2421 = vmatprep.mubr.msk.bf16.mxu1 (!%p575_p7), %vm2711_vm2, %v2709_v53  ;;  %s2899_s10 = scalar_lea.vmem (!%p575_p7), [#allocation2], %s2599_s7  ;;  %v783_v61 = vand.u32 (!%p575_p7), %v2632_v59, %v781_v60 }
  0x35   : > { %v2633_v62 = vld [vmem:[%s2899_s10] sm:$0xff] (!%p575_p7)   ;;  %v2635_v0 = vld [vmem:[%s2899_s10 + $0x8] sm:$0xff] (!%p575_p7)   ;;  %v2637_v2 = vld [vmem:[%s2899_s10 + $0x10] sm:$0xff] (!%p575_p7)  }
  0x36   : > { %2352 = vmatpush3.bf16.msra.mxu0 (!%p575_p7), %v2629_v54  ;;  %2414 = vmatpush3.bf16.msra.mxu1 (!%p575_p7), %v2629_v54  ;;  %v2634_v63 = vld [vmem:[%s2899_s10 + $0x64] sm:$0xff] (!%p575_p7)   ;;  %v2636_v1 = vld [vmem:[%s2899_s10 + $0x6c] sm:$0xff] (!%p575_p7)   ;;  %v2638_v3 = vld [vmem:[%s2899_s10 + $0x74] sm:$0xff] (!%p575_p7)  }
  0x37   : > { %2353 = vmatprep.subr.bf16.mxu0 (!%p575_p7), %v2709_v53  ;;  %2415 = vmatprep.subr.bf16.mxu1 (!%p575_p7), %v2709_v53  ;;  %v2639_v4 = vld [vmem:[%s2899_s10 + $0x18] sm:$0xff] (!%p575_p7)   ;;  %v2641_v6 = vld [vmem:[%s2899_s10 + $0x20] sm:$0xff] (!%p575_p7)   ;;  %v2643_v8 = vld [vmem:[%s2899_s10 + $0x28] sm:$0xff] (!%p575_p7)  }
  0x38   : > { %v2640_v5 = vld [vmem:[%s2899_s10 + $0x7c] sm:$0xff]   ;;  %v2642_v7 = vld [vmem:[%s2899_s10 + $0x84] sm:$0xff]   ;;  %v2644_v9 = vld [vmem:[%s2899_s10 + $0x8c] sm:$0xff]   ;;  %s3476_s15 = smov (!%p604_p8, %s2033_s15), 1 }
  0x39   : > { %v2645_v10 = vld [vmem:[%s2899_s10 + $0x30] sm:$0xff]   ;;  %v2647_v12 = vld [vmem:[%s2899_s10 + $0x38] sm:$0xff]   ;;  %v2649_v14 = vld [vmem:[%s2899_s10 + $0x40] sm:$0xff]   ;;  %s2600_s14 = smul.u32 100, %s3476_s15 }
  0x3a   : > { %2354 = vmatpush3.bf16.msra.mxu0 %v2630_v55  ;;  %2416 = vmatpush3.bf16.msra.mxu1 %v2630_v55  ;;  %v2646_v11 = vld [vmem:[%s2899_s10 + $0x94] sm:$0xff]   ;;  %v2648_v13 = vld [vmem:[%s2899_s10 + $0x9c] sm:$0xff]   ;;  %v2650_v15 = vld [vmem:[%s2899_s10 + $0xa4] sm:$0xff]  }
  0x3b   : > { %2355 = vmatprep.subr.bf16.mxu0 %v2709_v53  ;;  %2417 = vmatprep.subr.bf16.mxu1 %v2709_v53  ;;  %v2651_v16 = vld [vmem:[%s2899_s10 + $0x48] sm:$0xff]   ;;  %v2653_v18 = vld [vmem:[%s2899_s10 + $0x50] sm:$0xff]   ;;  %v2655_v20 = vld [vmem:[%s2899_s10 + $0x58] sm:$0xff]   ;;  %s3292_s22 = scalar_lea.vmem %s3448_s3, %s2600_s14 }
  0x3c   : > { %v2652_v17 = vld [vmem:[%s2899_s10 + $0xac] sm:$0xff]   ;;  %v2654_v19 = vld [vmem:[%s2899_s10 + $0xb4] sm:$0xff]   ;;  %v2656_v21 = vld [vmem:[%s2899_s10 + $0xbc] sm:$0xff]  }
  0x3d   : > { %v2657_v22 = vld [vmem:[%s2899_s10 + $0x60] ss:$0 sps:$4 sm:$0x33]   ;;  %v2658_v23 = vld [vmem:[%s2899_s10 + $0xc4] ss:$0 sps:$4 sm:$0x33]  }
  0x3e   : > { %2356 = vmatpush3.bf16.msra.mxu0 %v2631_v58  ;;  %2418 = vmatpush3.bf16.msra.mxu1 %v2631_v58  ;;  %v2659_v24 = vld [vmem:[%s2899_s10 + $0xc8] sm:$0xff]   ;;  %v2661_v26 = vld [vmem:[%s2899_s10 + $0xd0] sm:$0xff]   ;;  %v2663_v28 = vld [vmem:[%s2899_s10 + $0xd8] sm:$0xff]  }
  0x3f   : > { %2357 = vmatprep.subr.bf16.mxu0 %v2709_v53  ;;  %2419 = vmatprep.subr.bf16.mxu1 %v2709_v53  ;;  %v2660_v25 = vld [vmem:[%s2899_s10 + $0x12c] sm:$0xff]   ;;  %v2662_v27 = vld [vmem:[%s2899_s10 + $0x134] sm:$0xff]   ;;  %v2664_v29 = vld [vmem:[%s2899_s10 + $0x13c] sm:$0xff]  }
  0x40   : > { %v2665_v30 = vld [vmem:[%s2899_s10 + $0xe0] sm:$0xff]   ;;  %v2667_v32 = vld [vmem:[%s2899_s10 + $0xe8] sm:$0xff]   ;;  %v2669_v34 = vld [vmem:[%s2899_s10 + $0xf0] sm:$0xff]  }
  0x41   : > { %v2666_v31 = vld [vmem:[%s2899_s10 + $0x144] sm:$0xff]   ;;  %v2668_v33 = vld [vmem:[%s2899_s10 + $0x14c] sm:$0xff]   ;;  %v2670_v35 = vld [vmem:[%s2899_s10 + $0x154] sm:$0xff]  }
  0x42   : > { %2358 = vmatpush3.bf16.msra.mxu0 %v783_v61  ;;  %2420 = vmatpush3.bf16.msra.mxu1 %v783_v61  ;;  %v2671_v36 = vld [vmem:[%s2899_s10 + $0xf8] sm:$0xff]   ;;  %v2673_v38 = vld [vmem:[%s2899_s10 + $0x100] sm:$0xff]   ;;  %v2675_v40 = vld [vmem:[%s2899_s10 + $0x108] sm:$0xff]  }
  0x43   : > { %2473 = vmatprep.subr.bf16.mxu0 %v2709_v53  ;;  %2535 = vmatprep.subr.bf16.mxu1 %v2709_v53  ;;  %v2672_v37 = vld [vmem:[%s2899_s10 + $0x15c] sm:$0xff]   ;;  %v2674_v39 = vld [vmem:[%s2899_s10 + $0x164] sm:$0xff]   ;;  %v2676_v41 = vld [vmem:[%s2899_s10 + $0x16c] sm:$0xff]  }
  0x44   : > { %v2677_v42 = vld [vmem:[%s2899_s10 + $0x110] sm:$0xff]   ;;  %v2679_v44 = vld [vmem:[%s2899_s10 + $0x118] sm:$0xff]   ;;  %v2681_v46 = vld [vmem:[%s2899_s10 + $0x120] sm:$0xff]  }
  0x45   : > { %2360 = vmatmul.mubr.msk.bf16.vlgmr.msra.gmra.mrb[0].mxu0 %vm738_vm3, %v2633_v62  ;;  %2422 = vmatmul.mubr.msk.bf16.vlgmr.msra.gmra.mrb[0].mxu1 %vm738_vm3, %v2634_v63  ;;  %v2678_v43 = vld [vmem:[%s2899_s10 + $0x174] sm:$0xff]   ;;  %v2680_v45 = vld [vmem:[%s2899_s10 + $0x17c] sm:$0xff]   ;;  %v2682_v47 = vld [vmem:[%s2899_s10 + $0x184] sm:$0xff]  }
  0x46   : > { %2474 = vmatpush3.bf16.msra.mxu0 %v2628_v52  ;;  %2536 = vmatpush3.bf16.msra.mxu1 %v2628_v52  ;;  %v2683_v48 = vld [vmem:[%s2899_s10 + $0x128] ss:$0 sps:$4 sm:$0x33]   ;;  %v2684_v49 = vld [vmem:[%s2899_s10 + $0x18c] ss:$0 sps:$4 sm:$0x33]  }
  0x47   : > { %2363 = vmatprep.mubr.msk.bf16.mxu0 %vm2711_vm2, %v2709_v53  ;;  %2425 = vmatprep.mubr.msk.bf16.mxu1 %vm2711_vm2, %v2709_v53 }
  0x48   : > { %2475 = vmatprep.subr.bf16.mxu0 %v2709_v53  ;;  %2537 = vmatprep.subr.bf16.mxu1 %v2709_v53 }
  0x4a   : > { %2476 = vmatpush3.bf16.msra.mxu0 %v2629_v54  ;;  %2538 = vmatpush3.bf16.msra.mxu1 %v2629_v54 }
  0x4b   : > { %2477 = vmatprep.subr.bf16.mxu0 %v2709_v53  ;;  %2539 = vmatprep.subr.bf16.mxu1 %v2709_v53 }
  0x4d   : > { %2364 = vmatmul.mubr.msk.bf16.gmra.mrb[4].mxu0 %vm738_vm3, %v2635_v0  ;;  %2426 = vmatmul.mubr.msk.bf16.gmra.mrb[4].mxu1 %vm738_vm3, %v2636_v1 }
  0x4e   : > { %2367 = vmatprep.mubr.msk.bf16.mxu0 %vm2711_vm2, %v2709_v53  ;;  %2429 = vmatprep.mubr.msk.bf16.mxu1 %vm2711_vm2, %v2709_v53 }
  0x4f   : > { %2478 = vmatpush3.bf16.msra.mxu0 %v2630_v55  ;;  %2540 = vmatpush3.bf16.msra.mxu1 %v2630_v55 }
  0x50   : > { %2479 = vmatprep.subr.bf16.mxu0 %v2709_v53  ;;  %2541 = vmatprep.subr.bf16.mxu1 %v2709_v53 }
  0x53   : > { %2480 = vmatpush3.bf16.msra.mxu0 %v2631_v58  ;;  %2542 = vmatpush3.bf16.msra.mxu1 %v2631_v58 }
  0x54   : > { %2481 = vmatprep.subr.bf16.mxu0 %v2709_v53  ;;  %2543 = vmatprep.subr.bf16.mxu1 %v2709_v53 }
  0x55   : > { %2368 = vmatmul.mubr.msk.bf16.gmra.mrb[8].mxu0 %vm738_vm3, %v2637_v2  ;;  %2430 = vmatmul.mubr.msk.bf16.gmra.mrb[8].mxu1 %vm738_vm3, %v2638_v3 }
  0x56   : > { %2371 = vmatprep.mubr.msk.bf16.mxu0 %vm2711_vm2, %v2709_v53  ;;  %2433 = vmatprep.mubr.msk.bf16.mxu1 %vm2711_vm2, %v2709_v53 }
  0x57   : > { %2482 = vmatpush3.bf16.msra.mxu0 %v783_v61  ;;  %2544 = vmatpush3.bf16.msra.mxu1 %v783_v61 }
  0x5d   : > { %2372 = vmatmul.mubr.msk.bf16.gmra.mrb[12].mxu0 %vm738_vm3, %v2639_v4  ;;  %2434 = vmatmul.mubr.msk.bf16.gmra.mrb[12].mxu1 %vm738_vm3, %v2640_v5 }
  0x5e   : > { %2375 = vmatprep.mubr.msk.bf16.mxu0 %vm2711_vm2, %v2709_v53  ;;  %2437 = vmatprep.mubr.msk.bf16.mxu1 %vm2711_vm2, %v2709_v53 }
  0x65   : > { %2376 = vmatmul.mubr.msk.bf16.gmra.mrb[16].mxu0 %vm738_vm3, %v2641_v6  ;;  %2438 = vmatmul.mubr.msk.bf16.gmra.mrb[16].mxu1 %vm738_vm3, %v2642_v7 }
  0x66   : > { %2379 = vmatprep.mubr.msk.bf16.mxu0 %vm2711_vm2, %v2709_v53  ;;  %2441 = vmatprep.mubr.msk.bf16.mxu1 %vm2711_vm2, %v2709_v53 }
  0x6d   : > { %2380 = vmatmul.mubr.msk.bf16.gmra.mrb[20].mxu0 %vm738_vm3, %v2643_v8  ;;  %2442 = vmatmul.mubr.msk.bf16.gmra.mrb[20].mxu1 %vm738_vm3, %v2644_v9 }
  0x6e   : > { %2383 = vmatprep.mubr.msk.bf16.mxu0 %vm2711_vm2, %v2709_v53  ;;  %2445 = vmatprep.mubr.msk.bf16.mxu1 %vm2711_vm2, %v2709_v53 }
  0x75   : > { %2384 = vmatmul.mubr.msk.bf16.gmra.mrb[24].mxu0 %vm738_vm3, %v2645_v10  ;;  %2446 = vmatmul.mubr.msk.bf16.gmra.mrb[24].mxu1 %vm738_vm3, %v2646_v11 }
  0x76   : > { %2387 = vmatprep.mubr.msk.bf16.mxu0 %vm2711_vm2, %v2709_v53  ;;  %2449 = vmatprep.mubr.msk.bf16.mxu1 %vm2711_vm2, %v2709_v53 }
  0x7d   : > { %2388 = vmatmul.mubr.msk.bf16.gmra.mrb[28].mxu0 %vm738_vm3, %v2647_v12  ;;  %2450 = vmatmul.mubr.msk.bf16.gmra.mrb[28].mxu1 %vm738_vm3, %v2648_v13 }
  0x7e   : > { %2391 = vmatprep.mubr.msk.bf16.mxu0 %vm2711_vm2, %v2709_v53  ;;  %2453 = vmatprep.mubr.msk.bf16.mxu1 %vm2711_vm2, %v2709_v53 }
  0x85   : > { %2392 = vmatmul.mubr.msk.bf16.gmra.mrb[32].mxu0 %vm738_vm3, %v2649_v14  ;;  %2454 = vmatmul.mubr.msk.bf16.gmra.mrb[32].mxu1 %vm738_vm3, %v2650_v15 }
  0x86   : > { %2395 = vmatprep.mubr.msk.bf16.mxu0 %vm2711_vm2, %v2709_v53  ;;  %2457 = vmatprep.mubr.msk.bf16.mxu1 %vm2711_vm2, %v2709_v53 }
  0x8d   : > { %2396 = vmatmul.mubr.msk.bf16.gmra.mrb[36].mxu0 %vm738_vm3, %v2651_v16  ;;  %2458 = vmatmul.mubr.msk.bf16.gmra.mrb[36].mxu1 %vm738_vm3, %v2652_v17 }
  0x8e   : > { %2399 = vmatprep.mubr.msk.bf16.mxu0 %vm2711_vm2, %v2709_v53  ;;  %2461 = vmatprep.mubr.msk.bf16.mxu1 %vm2711_vm2, %v2709_v53 }
  0x95   : > { %2400 = vmatmul.mubr.msk.bf16.gmra.mrb[40].mxu0 %vm738_vm3, %v2653_v18  ;;  %2462 = vmatmul.mubr.msk.bf16.gmra.mrb[40].mxu1 %vm738_vm3, %v2654_v19 }
  0x96   : > { %2403 = vmatprep.mubr.msk.bf16.mxu0 %vm2711_vm2, %v2709_v53  ;;  %2465 = vmatprep.mubr.msk.bf16.mxu1 %vm2711_vm2, %v2709_v53 }
  0x9d   : > { %2404 = vmatmul.mubr.msk.bf16.gmra.mrb[44].mxu0 %vm738_vm3, %v2655_v20  ;;  %2466 = vmatmul.mubr.msk.bf16.gmra.mrb[44].mxu1 %vm738_vm3, %v2656_v21 }
  0x9e   : > { %2407 = vmatprep.mubr.msk.bf16.mxu0 %vm2711_vm2, %v2709_v53  ;;  %2469 = vmatprep.mubr.msk.bf16.mxu1 %vm2711_vm2, %v2709_v53 }
  0xa5   : > { %2408 = vmatmul.mubr.msk.bf16.gmra.mrb[48].mxu0 %vm738_vm3, %v2657_v22  ;;  %2470 = vmatmul.mubr.msk.bf16.gmra.mrb[48].mxu1 %vm738_vm3, %v2658_v23 }
  0xa6   : > { %2483 = vmatprep.mubr.msk.bf16.mxu0 %vm2711_vm2, %v2709_v53  ;;  %2545 = vmatprep.mubr.msk.bf16.mxu1 %vm2711_vm2, %v2709_v53 }
  0xad   : > { %2484 = vmatmul.mubr.msk.bf16.vlgmr.msra.gmra.mrb[52].mxu0 %vm738_vm3, %v2659_v24  ;;  %2546 = vmatmul.mubr.msk.bf16.vlgmr.msra.gmra.mrb[52].mxu1 %vm738_vm3, %v2660_v25 }
  0xae   : > { %2487 = vmatprep.mubr.msk.bf16.mxu0 %vm2711_vm2, %v2709_v53  ;;  %2549 = vmatprep.mubr.msk.bf16.mxu1 %vm2711_vm2, %v2709_v53 }
  0xb5   : > { %2488 = vmatmul.mubr.msk.bf16.gmra.mrb[56].mxu0 %vm738_vm3, %v2661_v26  ;;  %2550 = vmatmul.mubr.msk.bf16.gmra.mrb[56].mxu1 %vm738_vm3, %v2662_v27 }
  0xb6   : > { %2491 = vmatprep.mubr.msk.bf16.mxu0 %vm2711_vm2, %v2709_v53  ;;  %2553 = vmatprep.mubr.msk.bf16.mxu1 %vm2711_vm2, %v2709_v53 }
  0xbd   : > { %2492 = vmatmul.mubr.msk.bf16.gmra.mrb[60].mxu0 %vm738_vm3, %v2663_v28  ;;  %2554 = vmatmul.mubr.msk.bf16.gmra.mrb[60].mxu1 %vm738_vm3, %v2664_v29 }
  0xbe   : > { %2495 = vmatprep.mubr.msk.bf16.mxu0 %vm2711_vm2, %v2709_v53  ;;  %2557 = vmatprep.mubr.msk.bf16.mxu1 %vm2711_vm2, %v2709_v53 }
  0xc5   : > { %2496 = vmatmul.mubr.msk.bf16.gmra.mrb[64].mxu0 %vm738_vm3, %v2665_v30  ;;  %2558 = vmatmul.mubr.msk.bf16.gmra.mrb[64].mxu1 %vm738_vm3, %v2666_v31 }
  0xc6   : > { %2499 = vmatprep.mubr.msk.bf16.mxu0 %vm2711_vm2, %v2709_v53  ;;  %2561 = vmatprep.mubr.msk.bf16.mxu1 %vm2711_vm2, %v2709_v53 }
  0xcd   : > { %2500 = vmatmul.mubr.msk.bf16.gmra.mrb[68].mxu0 %vm738_vm3, %v2667_v32  ;;  %2562 = vmatmul.mubr.msk.bf16.gmra.mrb[68].mxu1 %vm738_vm3, %v2668_v33 }
  0xce   : > { %2503 = vmatprep.mubr.msk.bf16.mxu0 %vm2711_vm2, %v2709_v53  ;;  %2565 = vmatprep.mubr.msk.bf16.mxu1 %vm2711_vm2, %v2709_v53 }
  0xd5   : > { %2504 = vmatmul.mubr.msk.bf16.gmra.mrb[72].mxu0 %vm738_vm3, %v2669_v34  ;;  %2566 = vmatmul.mubr.msk.bf16.gmra.mrb[72].mxu1 %vm738_vm3, %v2670_v35 }
  0xd6   : > { %2507 = vmatprep.mubr.msk.bf16.mxu0 %vm2711_vm2, %v2709_v53  ;;  %2569 = vmatprep.mubr.msk.bf16.mxu1 %vm2711_vm2, %v2709_v53 }
  0xdd   : > { %2508 = vmatmul.mubr.msk.bf16.gmra.mrb[76].mxu0 %vm738_vm3, %v2671_v36  ;;  %2570 = vmatmul.mubr.msk.bf16.gmra.mrb[76].mxu1 %vm738_vm3, %v2672_v37 }
  0xde   : > { %2511 = vmatprep.mubr.msk.bf16.mxu0 %vm2711_vm2, %v2709_v53  ;;  %2573 = vmatprep.mubr.msk.bf16.mxu1 %vm2711_vm2, %v2709_v53 }
  0xe5   : > { %2512 = vmatmul.mubr.msk.bf16.gmra.mrb[80].mxu0 %vm738_vm3, %v2673_v38  ;;  %2574 = vmatmul.mubr.msk.bf16.gmra.mrb[80].mxu1 %vm738_vm3, %v2674_v39 }
  0xe6   : > { %2515 = vmatprep.mubr.msk.bf16.mxu0 %vm2711_vm2, %v2709_v53  ;;  %2577 = vmatprep.mubr.msk.bf16.mxu1 %vm2711_vm2, %v2709_v53 }
  0xed   : > { %2516 = vmatmul.mubr.msk.bf16.gmra.mrb[84].mxu0 %vm738_vm3, %v2675_v40  ;;  %2578 = vmatmul.mubr.msk.bf16.gmra.mrb[84].mxu1 %vm738_vm3, %v2676_v41 }
  0xee   : > { %2519 = vmatprep.mubr.msk.bf16.mxu0 %vm2711_vm2, %v2709_v53  ;;  %2581 = vmatprep.mubr.msk.bf16.mxu1 %vm2711_vm2, %v2709_v53 }
  0xf5   : > { %2520 = vmatmul.mubr.msk.bf16.gmra.mrb[88].mxu0 %vm738_vm3, %v2677_v42  ;;  %2582 = vmatmul.mubr.msk.bf16.gmra.mrb[88].mxu1 %vm738_vm3, %v2678_v43 }
  0xf6   : > { %2523 = vmatprep.mubr.msk.bf16.mxu0 %vm2711_vm2, %v2709_v53  ;;  %2585 = vmatprep.mubr.msk.bf16.mxu1 %vm2711_vm2, %v2709_v53 }
  0xfd   : > { %2524 = vmatmul.mubr.msk.bf16.gmra.mrb[92].mxu0 %vm738_vm3, %v2679_v44  ;;  %2586 = vmatmul.mubr.msk.bf16.gmra.mrb[92].mxu1 %vm738_vm3, %v2680_v45 }
  0xfe   : > { %2527 = vmatprep.mubr.msk.bf16.mxu0 %vm2711_vm2, %v2709_v53  ;;  %2589 = vmatprep.mubr.msk.bf16.mxu1 %vm2711_vm2, %v2709_v53 }
 0x105   : > { %2528 = vmatmul.mubr.msk.bf16.gmra.mrb[96].mxu0 %vm738_vm3, %v2681_v46  ;;  %2590 = vmatmul.mubr.msk.bf16.gmra.mrb[96].mxu1 %vm738_vm3, %v2682_v47 }
 0x106   : > { %2531 = vmatprep.mubr.msk.bf16.mxu0 %vm2711_vm2, %v2709_v53  ;;  %2593 = vmatprep.mubr.msk.bf16.mxu1 %vm2711_vm2, %v2709_v53 }
 0x10d   : > { %2532 = vmatmul.mubr.msk.bf16.gmra.mrb[100].mxu0 %vm738_vm3, %v2683_v48  ;;  %2594 = vmatmul.mubr.msk.bf16.gmra.mrb[100].mxu1 %vm738_vm3, %v2684_v49 }
 0x118   : > { %v3122_v50 = vpop.f32.mrb[0].mxu0  ;;  %v3124_v51 = vpop.f32.mrb[0].mxu1 }
 0x119   : > { %v1185_v52 = vmax.f32 %v3122_v50, %v3124_v51  ;;  %v2361_v54 = vpop.f32.mrb[1].mxu0  ;;  %v2423_v55 = vpop.f32.mrb[1].mxu1 }
 0x11a   : > { %v3128_v56 = vpop.f32.mrb[2].mxu0  ;;  %v3130_v57 = vpop.f32.mrb[2].mxu1 }
 0x11b   : > { %v1186_v53 = vmax.f32 %v3128_v56, %v3130_v57  ;;  %v2362_v58 = vpop.f32.mrb[3].mxu0  ;;  %v2424_v59 = vpop.f32.mrb[3].mxu1 }
 0x120   : > { %v3134_v60 = vpop.f32.mrb[4].mxu0  ;;  %v3136_v61 = vpop.f32.mrb[4].mxu1 }
 0x121   : > { %v2365_v63 = vpop.f32.mrb[5].mxu0  ;;  %v2427_v0 = vpop.f32.mrb[5].mxu1 }
 0x122   : > { %v3140_v1 = vpop.f32.mrb[6].mxu0  ;;  %v3142_v2 = vpop.f32.mrb[6].mxu1 }
 0x123   : > { %v2366_v4 = vpop.f32.mrb[7].mxu0  ;;  %v2428_v5 = vpop.f32.mrb[7].mxu1 }
 0x128   : > { %v3146_v6 = vpop.f32.mrb[8].mxu0  ;;  %v3148_v7 = vpop.f32.mrb[8].mxu1 }
 0x129   : > { %v2369_v9 = vpop.f32.mrb[9].mxu0  ;;  %v2431_v10 = vpop.f32.mrb[9].mxu1 }
 0x12a   : > { %v3152_v11 = vpop.f32.mrb[10].mxu0  ;;  %v3154_v12 = vpop.f32.mrb[10].mxu1 }
 0x12b   : > { %v2370_v14 = vpop.f32.mrb[11].mxu0  ;;  %v2432_v15 = vpop.f32.mrb[11].mxu1 }
 0x130   : > { %v3158_v16 = vpop.f32.mrb[12].mxu0  ;;  %v3160_v17 = vpop.f32.mrb[12].mxu1 }
 0x131   : > { %v2373_v19 = vpop.f32.mrb[13].mxu0  ;;  %v2435_v20 = vpop.f32.mrb[13].mxu1 }
 0x132   : > { %v3164_v21 = vpop.f32.mrb[14].mxu0  ;;  %v3166_v22 = vpop.f32.mrb[14].mxu1 }
 0x133   : > { %v2374_v24 = vpop.f32.mrb[15].mxu0  ;;  %v2436_v25 = vpop.f32.mrb[15].mxu1 }
 0x138   : > { %v3170_v26 = vpop.f32.mrb[16].mxu0  ;;  %v3172_v27 = vpop.f32.mrb[16].mxu1 }
 0x139   : > { %v2377_v29 = vpop.f32.mrb[17].mxu0  ;;  %v2439_v30 = vpop.f32.mrb[17].mxu1 }
 0x13a   : > { %v3176_v31 = vpop.f32.mrb[18].mxu0  ;;  %v3178_v32 = vpop.f32.mrb[18].mxu1 }
 0x13b   : > { %v2378_v34 = vpop.f32.mrb[19].mxu0  ;;  %v2440_v35 = vpop.f32.mrb[19].mxu1 }
 0x140   : > { %v3182_v36 = vpop.f32.mrb[20].mxu0  ;;  %v3184_v37 = vpop.f32.mrb[20].mxu1 }
 0x141   : > { %v2381_v39 = vpop.f32.mrb[21].mxu0  ;;  %v2443_v40 = vpop.f32.mrb[21].mxu1 }
 0x142   : > { %v3188_v41 = vpop.f32.mrb[22].mxu0  ;;  %v3190_v42 = vpop.f32.mrb[22].mxu1 }
 0x143   : > { %v2382_v44 = vpop.f32.mrb[23].mxu0  ;;  %v2444_v45 = vpop.f32.mrb[23].mxu1 }
 0x148   : > { %v3194_v46 = vpop.f32.mrb[24].mxu0  ;;  %v3196_v47 = vpop.f32.mrb[24].mxu1 }
 0x149   : > { %v2385_v49 = vpop.f32.mrb[25].mxu0  ;;  %v2447_v54 = vpop.f32.mrb[25].mxu1 }
 0x14a   : > { %v3200_v55 = vpop.f32.mrb[26].mxu0  ;;  %v3202_v58 = vpop.f32.mrb[26].mxu1 }
 0x14b   : > { %v2386_v63 = vpop.f32.mrb[27].mxu0  ;;  %v2448_v0 = vpop.f32.mrb[27].mxu1 }
 0x150   : > { %v3206_v4 = vpop.f32.mrb[28].mxu0  ;;  %v3208_v5 = vpop.f32.mrb[28].mxu1 }
 0x151   : > { %v2389_v10 = vpop.f32.mrb[29].mxu0  ;;  %v2451_v14 = vpop.f32.mrb[29].mxu1 }
 0x152   : > { %v3212_v15 = vpop.f32.mrb[30].mxu0  ;;  %v3214_v19 = vpop.f32.mrb[30].mxu1 }
 0x153   : > { %v2390_v24 = vpop.f32.mrb[31].mxu0  ;;  %v2452_v25 = vpop.f32.mrb[31].mxu1 }
 0x158   : > { %v3218_v29 = vpop.f32.mrb[32].mxu0  ;;  %v3220_v30 = vpop.f32.mrb[32].mxu1 }
 0x159   : > { %v2393_v35 = vpop.f32.mrb[33].mxu0  ;;  %v2455_v39 = vpop.f32.mrb[33].mxu1 }
 0x15a   : > { %v3224_v40 = vpop.f32.mrb[34].mxu0  ;;  %v3226_v44 = vpop.f32.mrb[34].mxu1 }
 0x15b   : > { %v2394_v49 = vpop.f32.mrb[35].mxu0  ;;  %v2456_v54 = vpop.f32.mrb[35].mxu1 }
 0x160   : > { %v3230_v63 = vpop.f32.mrb[36].mxu0  ;;  %v3232_v0 = vpop.f32.mrb[36].mxu1 }
 0x161   : > { %v2397_v14 = vpop.f32.mrb[37].mxu0  ;;  %v2459_v24 = vpop.f32.mrb[37].mxu1 }
 0x162   : > { %v3236_v25 = vpop.f32.mrb[38].mxu0  ;;  %v3238_v35 = vpop.f32.mrb[38].mxu1 }
 0x163   : > { %v2398_v34 = vpop.f32.mrb[39].mxu0  ;;  %v2460_v45 = vpop.f32.mrb[39].mxu1 }
 0x168   : > { %v3242_v49 = vpop.f32.mrb[40].mxu0  ;;  %v3244_v54 = vpop.f32.mrb[40].mxu1 }
 0x169   : > { %v2401_v9 = vpop.f32.mrb[41].mxu0  ;;  %v2463_v10 = vpop.f32.mrb[41].mxu1 }
 0x16a   : > { %v3248_v14 = vpop.f32.mrb[42].mxu0  ;;  %v3250_v24 = vpop.f32.mrb[42].mxu1 }
 0x16b   : > { %v2402_v48 = vpop.f32.mrb[43].mxu0  ;;  %v2464_v39 = vpop.f32.mrb[43].mxu1 }
 0x170   : > { %v3254_v34 = vpop.f32.mrb[44].mxu0  ;;  %v3256_v45 = vpop.f32.mrb[44].mxu1 }
 0x171   : > { %v2405_v38 = vpop.f32.mrb[45].mxu0  ;;  %v2467_v9 = vpop.f32.mrb[45].mxu1 }
 0x172   : > { %v3260_v10 = vpop.f32.mrb[46].mxu0  ;;  %v3262_v20 = vpop.f32.mrb[46].mxu1 }
 0x173   : > { %v2406_v48 = vpop.f32.mrb[47].mxu0  ;;  %v2468_v39 = vpop.f32.mrb[47].mxu1 }
 0x178   : > { %v3266_v33 = vpop.f32.mrb[48].mxu0  ;;  %v3268_v28 = vpop.f32.mrb[48].mxu1 }
 0x179   : > { %v2409_v38 = vpop.f32.mrb[49].mxu0  ;;  %v2471_v23 = vpop.f32.mrb[49].mxu1 }
 0x17a   : > { %v918_v9 = vpop.f32.mrb[50].mxu0  ;;  %v1182_v18 = vpop.f32.mrb[50].mxu1  ;;  %v3282_v23 = vld [vmem:[%s3447_s2] ss:$0 sm:$0xff] }
 0x17b   : > { %v2410_v13 = vpop.f32.mrb[51].mxu0  ;;  %v2472_v8 = vpop.f32.mrb[51].mxu1 }
 0x180   : > { %v1372_v3 = vpop.f32.mrb[52].mxu0  ;;  %v1661_v48 = vpop.f32.mrb[52].mxu1 }
 0x181   : > { %v1474_v39 = vmax.f32 %v1185_v52, %v1372_v3  ;;  %v2485_v59 = vpop.f32.mrb[53].mxu0  ;;  %v2547_v62 = vpop.f32.mrb[53].mxu1 }
 0x182   : > { %v1375_v18 = vpop.f32.mrb[54].mxu0  ;;  %v1664_v13 = vpop.f32.mrb[54].mxu1 }
 0x183   : > { %v1763_v8 = vmax.f32 %v1474_v39, %v1661_v48  ;;  %v1475_v38 = vmax.f32 %v1186_v53, %v1375_v18  ;;  %v2486_v9 = vpop.f32.mrb[55].mxu0  ;;  %v2548_v43 = vpop.f32.mrb[55].mxu1 }
 0x184   : > { %v3449_v43 = vmax.f32 %v3134_v60, %v3136_v61  ;;  %v3450_v9 = vmax.f32 %v3140_v1, %v3142_v2  ;;  %v3451_v1 = vmax.f32 %v3146_v6, %v3148_v7 }
 0x185   : > { %v1794_v50 = vadd.f32 %v3282_v23, %v1763_v8  ;;  %v1764_v51 = vmax.f32 %v1475_v38, %v1664_v13 }
 0x187   : > { %v1819_v52 = vmax.f32 %v1794_v50, 0.0  ;;  %v1795_v62 = vadd.f32 %v3282_v23, %v1764_v51 }
 0x188   : > { %v1380_v3 = vpop.f32.mrb[56].mxu0  ;;  %v1669_v56 = vpop.f32.mrb[56].mxu1 }
 0x189   : > { %v2252_v57 = vpack.c.bf16 %v1819_v52, %v1819_v52  ;;  %v1820_v53 = vmax.f32 %v1795_v62, 0.0  ;;  %v1476_v59 = vmax.f32 %v3449_v43, %v1380_v3  ;;  %v2489_v48 = vpop.f32.mrb[57].mxu0  ;;  %v2551_v39 = vpop.f32.mrb[57].mxu1 }
 0x18a   : > { %v1383_v18 = vpop.f32.mrb[58].mxu0  ;;  %v1672_v13 = vpop.f32.mrb[58].mxu1 }
 0x18b   : > { %1946 = vst.msk [vmem:[%s3292_s22] sm:$0xf] %vm1945_vm4, %v2252_v57  ;;  %v2253_v8 = vpack.c.bf16 %v1820_v53, %v1820_v53  ;;  %v1765_v38 = vmax.f32 %v1476_v59, %v1669_v56  ;;  %v1477_v50 = vmax.f32 %v3450_v9, %v1383_v18  ;;  %v2490_v51 = vpop.f32.mrb[59].mxu0  ;;  %v2552_v52 = vpop.f32.mrb[59].mxu1 }
 0x18d   : > { %1947 = vst.msk [vmem:[%s3292_s22 + $0x4] sm:$0xf] %vm1945_vm4, %v2253_v8  ;;  %v1796_v60 = vadd.f32 %v3282_v23, %v1765_v38  ;;  %v1766_v61 = vmax.f32 %v1477_v50, %v1672_v13  ;;  %v3452_v38 = vmax.f32 %v3152_v11, %v3154_v12  ;;  %v3453_v11 = vmax.f32 %v3158_v16, %v3160_v17 }
 0x18f   : > { %v1821_v62 = vmax.f32 %v1796_v60, 0.0  ;;  %v1797_v3 = vadd.f32 %v3282_v23, %v1766_v61 }
 0x190   : > { %v1388_v43 = vpop.f32.mrb[60].mxu0  ;;  %v1677_v57 = vpop.f32.mrb[60].mxu1 }
 0x191   : > { %v2254_v53 = vpack.c.bf16 %v1821_v62, %v1821_v62  ;;  %v1822_v56 = vmax.f32 %v1797_v3, 0.0  ;;  %v1478_v2 = vmax.f32 %v3451_v1, %v1388_v43  ;;  %v2493_v59 = vpop.f32.mrb[61].mxu0  ;;  %v2555_v48 = vpop.f32.mrb[61].mxu1 }
 0x192   : > { %v1391_v39 = vpop.f32.mrb[62].mxu0  ;;  %v1680_v18 = vpop.f32.mrb[62].mxu1  ;;  %v3454_v48 = vmax.f32 %v3164_v21, %v3166_v22  ;;  %v3455_v21 = vmax.f32 %v3170_v26, %v3172_v27 }
 0x193   : > { %1948 = vst.msk [vmem:[%s3292_s22 + $0x8] sm:$0xf] %vm1945_vm4, %v2254_v53  ;;  %v2255_v8 = vpack.c.bf16 %v1822_v56, %v1822_v56  ;;  %v1767_v13 = vmax.f32 %v1478_v2, %v1677_v57  ;;  %v1479_v9 = vmax.f32 %v3452_v38, %v1391_v39  ;;  %v2494_v50 = vpop.f32.mrb[63].mxu0  ;;  %v2556_v51 = vpop.f32.mrb[63].mxu1 }
 0x195   : > { %1949 = vst.msk [vmem:[%s3292_s22 + $0xc] sm:$0xf] %vm1945_vm4, %v2255_v8  ;;  %v1798_v6 = vadd.f32 %v3282_v23, %v1767_v13  ;;  %v1768_v7 = vmax.f32 %v1479_v9, %v1680_v18 }
 0x197   : > { %v1823_v52 = vmax.f32 %v1798_v6, 0.0  ;;  %v1799_v60 = vadd.f32 %v3282_v23, %v1768_v7 }
 0x198   : > { %v1396_v61 = vpop.f32.mrb[64].mxu0  ;;  %v1685_v62 = vpop.f32.mrb[64].mxu1 }
 0x199   : > { %v2256_v3 = vpack.c.bf16 %v1823_v52, %v1823_v52  ;;  %v1824_v43 = vmax.f32 %v1799_v60, 0.0  ;;  %v1480_v12 = vmax.f32 %v3453_v11, %v1396_v61  ;;  %v2497_v57 = vpop.f32.mrb[65].mxu0  ;;  %v2559_v53 = vpop.f32.mrb[65].mxu1 }
 0x19a   : > { %v1399_v56 = vpop.f32.mrb[66].mxu0  ;;  %v1688_v1 = vpop.f32.mrb[66].mxu1 }
 0x19b   : > { %1950 = vst.msk [vmem:[%s3292_s22 + $0x10] sm:$0xf] %vm1945_vm4, %v2256_v3  ;;  %v2257_v2 = vpack.c.bf16 %v1824_v43, %v1824_v43  ;;  %v1769_v59 = vmax.f32 %v1480_v12, %v1685_v62  ;;  %v1481_v39 = vmax.f32 %v3454_v48, %v1399_v56  ;;  %v2498_v18 = vpop.f32.mrb[67].mxu0  ;;  %v2560_v8 = vpop.f32.mrb[67].mxu1  ;;  %v3456_v43 = vmax.f32 %v3176_v31, %v3178_v32 }
 0x19c   : > { %v3457_v31 = vmax.f32 %v3182_v36, %v3184_v37 }
 0x19d   : > { %1951 = vst.msk [vmem:[%s3292_s22 + $0x14] sm:$0xf] %vm1945_vm4, %v2257_v2  ;;  %v1800_v16 = vadd.f32 %v3282_v23, %v1769_v59  ;;  %v1770_v17 = vmax.f32 %v1481_v39, %v1688_v1 }
 0x19f   : > { %v1825_v13 = vmax.f32 %v1800_v16, 0.0  ;;  %v1801_v38 = vadd.f32 %v3282_v23, %v1770_v17 }
 0x1a0   : > { %v1404_v9 = vpop.f32.mrb[68].mxu0  ;;  %v1693_v50 = vpop.f32.mrb[68].mxu1 }
 0x1a1   : > { %v2258_v51 = vpack.c.bf16 %v1825_v13, %v1825_v13  ;;  %v1826_v6 = vmax.f32 %v1801_v38, 0.0  ;;  %v1482_v22 = vmax.f32 %v3455_v21, %v1404_v9  ;;  %v2501_v7 = vpop.f32.mrb[69].mxu0  ;;  %v2563_v52 = vpop.f32.mrb[69].mxu1  ;;  %v3458_v38 = vmax.f32 %v3188_v41, %v3190_v42 }
 0x1a2   : > { %v1407_v60 = vpop.f32.mrb[70].mxu0  ;;  %v1696_v61 = vpop.f32.mrb[70].mxu1  ;;  %v3459_v41 = vmax.f32 %v3194_v46, %v3196_v47 }
 0x1a3   : > { %1952 = vst.msk [vmem:[%s3292_s22 + $0x18] sm:$0xf] %vm1945_vm4, %v2258_v51  ;;  %v2259_v62 = vpack.c.bf16 %v1826_v6, %v1826_v6  ;;  %v1771_v3 = vmax.f32 %v1482_v22, %v1693_v50  ;;  %v1483_v11 = vmax.f32 %v3456_v43, %v1407_v60  ;;  %v2502_v12 = vpop.f32.mrb[71].mxu0  ;;  %v2564_v57 = vpop.f32.mrb[71].mxu1 }
 0x1a4   : > { %v3460_v57 = vmax.f32 %v3200_v55, %v3202_v58  ;;  %v3461_v55 = vmax.f32 %v3206_v4, %v3208_v5 }
 0x1a5   : > { %1953 = vst.msk [vmem:[%s3292_s22 + $0x1c] sm:$0xf] %vm1945_vm4, %v2259_v62  ;;  %v1802_v26 = vadd.f32 %v3282_v23, %v1771_v3  ;;  %v1772_v27 = vmax.f32 %v1483_v11, %v1696_v61 }
 0x1a7   : > { %v1827_v53 = vmax.f32 %v1802_v26, 0.0  ;;  %v1803_v56 = vadd.f32 %v3282_v23, %v1772_v27 }
 0x1a8   : > { %v1412_v1 = vpop.f32.mrb[72].mxu0  ;;  %v1701_v2 = vpop.f32.mrb[72].mxu1 }
 0x1a9   : > { %v2260_v59 = vpack.c.bf16 %v1827_v53, %v1827_v53  ;;  %v1828_v48 = vmax.f32 %v1803_v56, 0.0  ;;  %v1484_v32 = vmax.f32 %v3457_v31, %v1412_v1  ;;  %v2505_v39 = vpop.f32.mrb[73].mxu0  ;;  %v2567_v18 = vpop.f32.mrb[73].mxu1 }
 0x1aa   : > { %v1415_v8 = vpop.f32.mrb[74].mxu0  ;;  %v1704_v16 = vpop.f32.mrb[74].mxu1 }
 0x1ab   : > { %1954 = vst.msk [vmem:[%s3292_s22 + $0x20] sm:$0xf] %vm1945_vm4, %v2260_v59  ;;  %v2261_v17 = vpack.c.bf16 %v1828_v48, %v1828_v48  ;;  %v1773_v13 = vmax.f32 %v1484_v32, %v1701_v2  ;;  %v1485_v9 = vmax.f32 %v3458_v38, %v1415_v8  ;;  %v2506_v50 = vpop.f32.mrb[75].mxu0  ;;  %v2568_v51 = vpop.f32.mrb[75].mxu1 }
 0x1ad   : > { %1955 = vst.msk [vmem:[%s3292_s22 + $0x24] sm:$0xf] %vm1945_vm4, %v2261_v17  ;;  %v1804_v36 = vadd.f32 %v3282_v23, %v1773_v13  ;;  %v1774_v37 = vmax.f32 %v1485_v9, %v1704_v16  ;;  %v3462_v13 = vmax.f32 %v3212_v15, %v3214_v19  ;;  %v3463_v15 = vmax.f32 %v3218_v29, %v3220_v30 }
 0x1af   : > { %v1829_v6 = vmax.f32 %v1804_v36, 0.0  ;;  %v1805_v21 = vadd.f32 %v3282_v23, %v1774_v37 }
 0x1b0   : > { %v1420_v22 = vpop.f32.mrb[76].mxu0  ;;  %v1709_v7 = vpop.f32.mrb[76].mxu1 }
 0x1b1   : > { %v2262_v52 = vpack.c.bf16 %v1829_v6, %v1829_v6  ;;  %v1830_v60 = vmax.f32 %v1805_v21, 0.0  ;;  %v1486_v42 = vmax.f32 %v3459_v41, %v1420_v22  ;;  %v2509_v61 = vpop.f32.mrb[77].mxu0  ;;  %v2571_v62 = vpop.f32.mrb[77].mxu1 }
 0x1b2   : > { %v1423_v3 = vpop.f32.mrb[78].mxu0  ;;  %v1712_v43 = vpop.f32.mrb[78].mxu1  ;;  %v3464_v62 = vmax.f32 %v3224_v40, %v3226_v44  ;;  %v3465_v40 = vmax.f32 %v3230_v63, %v3232_v0 }
 0x1b3   : > { %1956 = vst.msk [vmem:[%s3292_s22 + $0x28] sm:$0xf] %vm1945_vm4, %v2262_v52  ;;  %v2263_v11 = vpack.c.bf16 %v1830_v60, %v1830_v60  ;;  %v1775_v12 = vmax.f32 %v1486_v42, %v1709_v7  ;;  %v1487_v26 = vmax.f32 %v3460_v57, %v1423_v3  ;;  %v2510_v27 = vpop.f32.mrb[79].mxu0  ;;  %v2572_v53 = vpop.f32.mrb[79].mxu1 }
 0x1b5   : > { %1957 = vst.msk [vmem:[%s3292_s22 + $0x2c] sm:$0xf] %vm1945_vm4, %v2263_v11  ;;  %v1806_v46 = vadd.f32 %v3282_v23, %v1775_v12  ;;  %v1776_v47 = vmax.f32 %v1487_v26, %v1712_v43 }
 0x1b7   : > { %v1831_v56 = vmax.f32 %v1806_v46, 0.0  ;;  %v1807_v1 = vadd.f32 %v3282_v23, %v1776_v47 }
 0x1b8   : > { %v1428_v2 = vpop.f32.mrb[80].mxu0  ;;  %v1717_v59 = vpop.f32.mrb[80].mxu1 }
 0x1b9   : > { %v2264_v48 = vpack.c.bf16 %v1831_v56, %v1831_v56  ;;  %v1832_v31 = vmax.f32 %v1807_v1, 0.0  ;;  %v1488_v58 = vmax.f32 %v3461_v55, %v1428_v2  ;;  %v2513_v32 = vpop.f32.mrb[81].mxu0  ;;  %v2575_v39 = vpop.f32.mrb[81].mxu1 }
 0x1ba   : > { %v1431_v18 = vpop.f32.mrb[82].mxu0  ;;  %v1720_v8 = vpop.f32.mrb[82].mxu1 }
 0x1bb   : > { %1958 = vst.msk [vmem:[%s3292_s22 + $0x30] sm:$0xf] %vm1945_vm4, %v2264_v48  ;;  %v2265_v16 = vpack.c.bf16 %v1832_v31, %v1832_v31  ;;  %v1777_v17 = vmax.f32 %v1488_v58, %v1717_v59  ;;  %v1489_v38 = vmax.f32 %v3462_v13, %v1431_v18  ;;  %v2514_v9 = vpop.f32.mrb[83].mxu0  ;;  %v2576_v50 = vpop.f32.mrb[83].mxu1  ;;  %v3466_v31 = vmax.f32 %v3236_v25, %v3238_v35 }
 0x1bc   : > { %v3467_v25 = vmax.f32 %v3242_v49, %v3244_v54 }
 0x1bd   : > { %1959 = vst.msk [vmem:[%s3292_s22 + $0x34] sm:$0xf] %vm1945_vm4, %v2265_v16  ;;  %v1808_v4 = vadd.f32 %v3282_v23, %v1777_v17  ;;  %v1778_v5 = vmax.f32 %v1489_v38, %v1720_v8 }
 0x1bf   : > { %v1833_v51 = vmax.f32 %v1808_v4, 0.0  ;;  %v1809_v36 = vadd.f32 %v3282_v23, %v1778_v5 }
 0x1c0   : > { %v1436_v37 = vpop.f32.mrb[84].mxu0  ;;  %v1725_v6 = vpop.f32.mrb[84].mxu1 }
 0x1c1   : > { %v2266_v21 = vpack.c.bf16 %v1833_v51, %v1833_v51  ;;  %v1834_v22 = vmax.f32 %v1809_v36, 0.0  ;;  %v1490_v19 = vmax.f32 %v3463_v15, %v1436_v37  ;;  %v2517_v7 = vpop.f32.mrb[85].mxu0  ;;  %v2579_v52 = vpop.f32.mrb[85].mxu1  ;;  %v3468_v36 = vmax.f32 %v3248_v14, %v3250_v24 }
 0x1c2   : > { %v1439_v60 = vpop.f32.mrb[86].mxu0  ;;  %v1728_v41 = vpop.f32.mrb[86].mxu1  ;;  %v3469_v14 = vmax.f32 %v3254_v34, %v3256_v45 }
 0x1c3   : > { %1960 = vst.msk [vmem:[%s3292_s22 + $0x38] sm:$0xf] %vm1945_vm4, %v2266_v21  ;;  %v2267_v42 = vpack.c.bf16 %v1834_v22, %v1834_v22  ;;  %v1779_v61 = vmax.f32 %v1490_v19, %v1725_v6  ;;  %v1491_v3 = vmax.f32 %v3464_v62, %v1439_v60  ;;  %v2518_v43 = vpop.f32.mrb[87].mxu0  ;;  %v2580_v11 = vpop.f32.mrb[87].mxu1 }
 0x1c4   : > { %v3470_v11 = vmax.f32 %v3260_v10, %v3262_v20  ;;  %v3471_v20 = vmax.f32 %v3266_v33, %v3268_v28 }
 0x1c5   : > { %1961 = vst.msk [vmem:[%s3292_s22 + $0x3c] sm:$0xf] %vm1945_vm4, %v2267_v42  ;;  %v1810_v29 = vadd.f32 %v3282_v23, %v1779_v61  ;;  %v1780_v30 = vmax.f32 %v1491_v3, %v1728_v41 }
 0x1c7   : > { %v1835_v12 = vmax.f32 %v1810_v29, 0.0  ;;  %v1811_v57 = vadd.f32 %v3282_v23, %v1780_v30 }
 0x1c8   : > { %v1444_v26 = vpop.f32.mrb[88].mxu0  ;;  %v1733_v27 = vpop.f32.mrb[88].mxu1 }
 0x1c9   : > { %v2268_v53 = vpack.c.bf16 %v1835_v12, %v1835_v12  ;;  %v1836_v46 = vmax.f32 %v1811_v57, 0.0  ;;  %v1492_v44 = vmax.f32 %v3465_v40, %v1444_v26  ;;  %v2521_v47 = vpop.f32.mrb[89].mxu0  ;;  %v2583_v56 = vpop.f32.mrb[89].mxu1 }
 0x1ca   : > { %v1447_v1 = vpop.f32.mrb[90].mxu0  ;;  %v1736_v2 = vpop.f32.mrb[90].mxu1 }
 0x1cb   : > { %1962 = vst.msk [vmem:[%s3292_s22 + $0x40] sm:$0xf] %vm1945_vm4, %v2268_v53  ;;  %v2269_v59 = vpack.c.bf16 %v1836_v46, %v1836_v46  ;;  %v1781_v48 = vmax.f32 %v1492_v44, %v1733_v27  ;;  %v1493_v55 = vmax.f32 %v3466_v31, %v1447_v1  ;;  %v2522_v58 = vpop.f32.mrb[91].mxu0  ;;  %v2584_v32 = vpop.f32.mrb[91].mxu1 }
 0x1cd   : > { %1963 = vst.msk [vmem:[%s3292_s22 + $0x44] sm:$0xf] %vm1945_vm4, %v2269_v59  ;;  %v1812_v63 = vadd.f32 %v3282_v23, %v1781_v48  ;;  %v1782_v0 = vmax.f32 %v1493_v55, %v1736_v2 }
 0x1cf   : > { %v1837_v39 = vmax.f32 %v1812_v63, 0.0  ;;  %v1813_v18 = vadd.f32 %v3282_v23, %v1782_v0 }
 0x1d0   : > { %v1452_v8 = vpop.f32.mrb[92].mxu0  ;;  %v1741_v16 = vpop.f32.mrb[92].mxu1 }
 0x1d1   : > { %v2270_v17 = vpack.c.bf16 %v1837_v39, %v1837_v39  ;;  %v1838_v13 = vmax.f32 %v1813_v18, 0.0  ;;  %v1494_v35 = vmax.f32 %v3467_v25, %v1452_v8  ;;  %v2525_v38 = vpop.f32.mrb[93].mxu0  ;;  %v2587_v9 = vpop.f32.mrb[93].mxu1 }
 0x1d2   : > { %v1455_v50 = vpop.f32.mrb[94].mxu0  ;;  %v1744_v4 = vpop.f32.mrb[94].mxu1 }
 0x1d3   : > { %1964 = vst.msk [vmem:[%s3292_s22 + $0x48] sm:$0xf] %vm1945_vm4, %v2270_v17  ;;  %v2271_v5 = vpack.c.bf16 %v1838_v13, %v1838_v13  ;;  %v1783_v51 = vmax.f32 %v1494_v35, %v1741_v16  ;;  %v1495_v37 = vmax.f32 %v3468_v36, %v1455_v50  ;;  %v2526_v6 = vpop.f32.mrb[95].mxu0  ;;  %v2588_v21 = vpop.f32.mrb[95].mxu1 }
 0x1d5   : > { %1965 = vst.msk [vmem:[%s3292_s22 + $0x4c] sm:$0xf] %vm1945_vm4, %v2271_v5  ;;  %v1814_v49 = vadd.f32 %v3282_v23, %v1783_v51  ;;  %v1784_v54 = vmax.f32 %v1495_v37, %v1744_v4 }
 0x1d7   : > { %v1839_v22 = vmax.f32 %v1814_v49, 0.0  ;;  %v1815_v15 = vadd.f32 %v3282_v23, %v1784_v54 }
 0x1d8   : > { %v1460_v19 = vpop.f32.mrb[96].mxu0  ;;  %v1749_v7 = vpop.f32.mrb[96].mxu1 }
 0x1d9   : > { %v2272_v52 = vpack.c.bf16 %v1839_v22, %v1839_v22  ;;  %v1840_v60 = vmax.f32 %v1815_v15, 0.0  ;;  %v1496_v24 = vmax.f32 %v3469_v14, %v1460_v19  ;;  %v2529_v41 = vpop.f32.mrb[97].mxu0  ;;  %v2591_v42 = vpop.f32.mrb[97].mxu1 }
 0x1da   : > { %v1463_v61 = vpop.f32.mrb[98].mxu0  ;;  %v1752_v62 = vpop.f32.mrb[98].mxu1 }
 0x1db   : > { %1966 = vst.msk [vmem:[%s3292_s22 + $0x50] sm:$0xf] %vm1945_vm4, %v2272_v52  ;;  %v2273_v3 = vpack.c.bf16 %v1840_v60, %v1840_v60  ;;  %v1785_v43 = vmax.f32 %v1496_v24, %v1749_v7  ;;  %v1497_v29 = vmax.f32 %v3470_v11, %v1463_v61  ;;  %v2530_v30 = vpop.f32.mrb[99].mxu0  ;;  %v2592_v12 = vpop.f32.mrb[99].mxu1 }
 0x1dd   : > { %1967 = vst.msk [vmem:[%s3292_s22 + $0x54] sm:$0xf] %vm1945_vm4, %v2273_v3  ;;  %v1816_v34 = vadd.f32 %v3282_v23, %v1785_v43  ;;  %v1786_v45 = vmax.f32 %v1497_v29, %v1752_v62 }
 0x1df   : > { %v1841_v57 = vmax.f32 %v1816_v34, 0.0  ;;  %v1817_v26 = vadd.f32 %v3282_v23, %v1786_v45 }
 0x1e0   : > { %v1468_v27 = vpop.f32.mrb[100].mxu0  ;;  %v1757_v53 = vpop.f32.mrb[100].mxu1 }
 0x1e1   : > { %v2274_v46 = vpack.c.bf16 %v1841_v57, %v1841_v57  ;;  %v1842_v40 = vmax.f32 %v1817_v26, 0.0  ;;  %v1498_v10 = vmax.f32 %v3471_v20, %v1468_v27  ;;  %v2533_v44 = vpop.f32.mrb[101].mxu0  ;;  %v2595_v47 = vpop.f32.mrb[101].mxu1 }
 0x1e2   : > { %v1471_v56 = vpop.f32.mrb[102].mxu0  ;;  %v1760_v1 = vpop.f32.mrb[102].mxu1 }
 0x1e3   : > { %1968 = vst.msk [vmem:[%s3292_s22 + $0x58] sm:$0xf] %vm1945_vm4, %v2274_v46  ;;  %v2275_v2 = vpack.c.bf16 %v1842_v40, %v1842_v40  ;;  %v1787_v59 = vmax.f32 %v1498_v10, %v1757_v53  ;;  %v2534_v48 = vpop.f32.mrb[103].mxu0  ;;  %v2596_v31 = vpop.f32.mrb[103].mxu1 }
 0x1e5   : > { %1969 = vst.msk [vmem:[%s3292_s22 + $0x5c] sm:$0xf] %vm1945_vm4, %v2275_v2  ;;  %v1818_v55 = vadd.f32 %v3282_v23, %v1787_v59 }
 0x1e7   : > { %v1843_v58 = vmax.f32 %v1818_v55, 0.0 }
 0x1e9   : > { %v2276_v32 = vpack.c.bf16 %v1843_v58, %v1843_v58 }
 0x1eb   : > { %1971 = vst.msk [vmem:[%s3292_s22 + $0x60] sm:$0x3] %vm1970_vm5, %v2276_v32 }
 0x1ec PF: > { %p10_p9 = scmp.ge.s32.totalorder %s2749_s16, 4   ;;  %s3472_s12 = smov %s2703_s13 }
 0x1ed   : > { %s3473_s13 = smov %s2758_s19  ;;  %s3474_s14 = smov %s2749_s16 }
 0x1ee   :  { %12 = sbr.rel (!%p10_p9) target bundleno = 2 (0x2), region = 111 }

// kernel: model_forward.3
= control target key start
LH: loop header
LB: loop body
LE: loop exit
PB: predicated region body
PF: predicated region fallthrough
CT: control target
= control target key end

     0   :  { %v631_v27 = vlaneseq  ;;  %v4648_v35 = vmov 1966171168   ;;  %s5691_s0 = inlined_call_operand.vmem [shape: bf16[2,4704], index: 0, kind: input, shape index: {}]   ;;  %s5692_s1 = inlined_call_operand.vmem [shape: bf16[4704,120], index: 1, kind: input, shape index: {}]   ;;  %s5693_s2 = inlined_call_operand.vmem [shape: f32[1,120], index: 2, kind: input, shape index: {}]   ;;  %s5694_s3 = inlined_call_operand.vmem [shape: bf16[120,10], index: 3, kind: input, shape index: {}]   ;;  %s5695_s4 = inlined_call_operand.vmem [shape: f32[1,10], index: 4, kind: input, shape index: {}]   ;;  %s5696_s5 = inlined_call_operand.hbm [shape: f32[2,10], index: 5, kind: output, shape index: {}]  }
   0x1   :  { %v4317_v0 = vld [vmem:[%s5692_s1 + $0x40] sm:$0xff]   ;;  %v4321_v4 = vld [vmem:[%s5692_s1 + $0x48] sm:$0xff]   ;;  %v4325_v8 = vld [vmem:[%s5692_s1 + $0x50] sm:$0xff]   ;;  %v629_v36 = vunpack.c.l.s4 %v4648_v35 }
   0x2   :  { %v4318_v1 = vld [vmem:[%s5692_s1] sm:$0xff]   ;;  %3865 = vmatprep.subr.bf16.mxu0 %v4317_v0  ;;  %v4322_v5 = vld [vmem:[%s5692_s1 + $0x8] sm:$0xff]   ;;  %v4326_v9 = vld [vmem:[%s5692_s1 + $0x10] sm:$0xff]   ;;  %v632_v32 = vshrl.u32 %v631_v27, 7 }
   0x3   :  { %v4319_v2 = vld [vmem:[%s5692_s1 + $0xc0] sm:$0xff]   ;;  %3866 = vmatpush3.bf16.msra.mxu0 %v4318_v1  ;;  %v4323_v6 = vld [vmem:[%s5692_s1 + $0xc8] sm:$0xff]   ;;  %v4327_v10 = vld [vmem:[%s5692_s1 + $0xd0] sm:$0xff]   ;;  %v630_v39 = vunpack.c.0.s8 %v629_v36 }
   0x4   :  { %v4320_v3 = vld [vmem:[%s5692_s1 + $0x80] sm:$0xff]   ;;  %3887 = vmatprep.subr.bf16.mxu1 %v4319_v2  ;;  %3867 = vmatprep.subr.bf16.mxu0 %v4321_v4  ;;  %v4324_v7 = vld [vmem:[%s5692_s1 + $0x88] sm:$0xff]   ;;  %v4328_v11 = vld [vmem:[%s5692_s1 + $0x90] sm:$0xff]  }
   0x5   :  { %3888 = vmatpush3.bf16.msra.mxu1 %v4320_v3  ;;  %v4329_v12 = vld [vmem:[%s5692_s1 + $0x58] sm:$0xff]   ;;  %v4333_v16 = vld [vmem:[%s5692_s1 + $0x60] sm:$0xff]   ;;  %v4337_v20 = vld [vmem:[%s5692_s1 + $0x68] sm:$0xff]   ;;  %v4787_v41 = vsub.s32 %v630_v39, %v632_v32 }
   0x6   :  { %3889 = vmatprep.subr.bf16.mxu1 %v4323_v6  ;;  %v4330_v13 = vld [vmem:[%s5692_s1 + $0x18] sm:$0xff]   ;;  %v4334_v17 = vld [vmem:[%s5692_s1 + $0x20] sm:$0xff]   ;;  %v4338_v21 = vld [vmem:[%s5692_s1 + $0x28] sm:$0xff]  }
   0x7   :  { %3868 = vmatpush3.bf16.msra.mxu0 %v4322_v5  ;;  %v4331_v14 = vld [vmem:[%s5692_s1 + $0xd8] sm:$0xff]   ;;  %v4335_v18 = vld [vmem:[%s5692_s1 + $0xe0] sm:$0xff]   ;;  %v4339_v22 = vld [vmem:[%s5692_s1 + $0xe8] sm:$0xff]  }
   0x8   :  { %3869 = vmatprep.subr.bf16.mxu0 %v4325_v8  ;;  %v4332_v15 = vld [vmem:[%s5692_s1 + $0x98] sm:$0xff]   ;;  %v4336_v19 = vld [vmem:[%s5692_s1 + $0xa0] sm:$0xff]   ;;  %v4340_v23 = vld [vmem:[%s5692_s1 + $0xa8] sm:$0xff]  }
   0x9   :  { %3890 = vmatpush3.bf16.msra.mxu1 %v4324_v7  ;;  %v4341_v24 = vld [vmem:[%s5692_s1 + $0x70] sm:$0xff]   ;;  %v4345_v29 = vld [vmem:[%s5692_s1 + $0x78] sm:$0xff]   ;;  %v22_v33 = vld [vmem:[%s5691_s0] sm:$0xff] }
   0xa   :  { %3891 = vmatprep.subr.bf16.mxu1 %v4327_v10  ;;  %v4342_v25 = vld [vmem:[%s5692_s1 + $0x30] sm:$0xff]   ;;  %v4346_v30 = vld [vmem:[%s5692_s1 + $0x38] sm:$0xff]   ;;  %v4350_v37 = vld [vmem:[%s5692_s1 + $0x140] sm:$0xff]   ;;  %v627_v38 = vcombine.high %v22_v33, %v22_v33  ;;  %v634_v42 = vrot.slane %v22_v33, %v4787_v41 }
   0xb   :  { %3870 = vmatpush3.bf16.msra.mxu0 %v4326_v9  ;;  %v4343_v26 = vld [vmem:[%s5692_s1 + $0xf0] sm:$0xff]   ;;  %v4347_v31 = vld [vmem:[%s5692_s1 + $0xf8] sm:$0xff]   ;;  %v4352_v40 = vld [vmem:[%s5692_s1 + $0x1c0] sm:$0xff]  }
   0xc   :  { %3871 = vmatprep.subr.bf16.mxu0 %v4329_v12  ;;  %v4344_v28 = vld [vmem:[%s5692_s1 + $0xb0] sm:$0xff]   ;;  %v4349_v34 = vld [vmem:[%s5692_s1 + $0xb8] sm:$0xff]   ;;  %v4791_v43 = vrot.slane %v627_v38, %v4787_v41  ;;  %v642_v44 = vcombine.high %v634_v42, %v634_v42  ;;  %v650_v45 = vrot.slane %v634_v42, %v4787_v41  ;;  %v4351_v47 = vld [vmem:[%s5692_s1 + $0x100] sm:$0xff]  }
   0xd   :  { %3892 = vmatpush3.bf16.msra.mxu1 %v4328_v11  ;;  %v4353_v49 = vld [vmem:[%s5692_s1 + $0x180] sm:$0xff]   ;;  %v4354_v52 = vld [vmem:[%s5692_s1 + $0x148] sm:$0xff]   ;;  %v4358_v58 = vld [vmem:[%s5692_s1 + $0x150] sm:$0xff]  }
   0xe   :  { %3893 = vmatprep.subr.bf16.mxu1 %v4331_v14  ;;  %v643_v46 = vcombine.high %v4791_v43, %v4791_v43  ;;  %v664_v48 = vrot.slane %v642_v44, %v4787_v41  ;;  %v672_v51 = vcombine.high %v650_v45, %v650_v45  ;;  %v4355_v54 = vld [vmem:[%s5692_s1 + $0x108] sm:$0xff]   ;;  %v4359_v59 = vld [vmem:[%s5692_s1 + $0x110] sm:$0xff]   ;;  %v4362_v62 = vld [vmem:[%s5692_s1 + $0x158] sm:$0xff]  }
   0xf   :  { %3872 = vmatpush3.bf16.msra.mxu0 %v4330_v13  ;;  %v4356_v55 = vld [vmem:[%s5692_s1 + $0x1c8] sm:$0xff]   ;;  %v4360_v60 = vld [vmem:[%s5692_s1 + $0x1d0] sm:$0xff]   ;;  %v4363_v63 = vld [vmem:[%s5692_s1 + $0x118] sm:$0xff]  }
  0x10   :  { %3873 = vmatprep.subr.bf16.mxu0 %v4333_v16  ;;  %v671_v50 = vrot.slane %v643_v46, %v4787_v41  ;;  %2698 = vmatprep.mubr.bf16.mxu0 %v664_v48  ;;  %v674_v53 = vcombine.high %v664_v48, %v664_v48  ;;  %v4357_v57 = vld [vmem:[%s5692_s1 + $0x188] sm:$0xff]   ;;  %v4361_v61 = vld [vmem:[%s5692_s1 + $0x190] sm:$0xff]   ;;  %v4364_v0 = vld [vmem:[%s5692_s1 + $0x1d8] sm:$0xff]  }
  0x11   :  { %3894 = vmatpush3.bf16.msra.mxu1 %v4332_v15  ;;  %v4365_v1 = vld [vmem:[%s5692_s1 + $0x198] sm:$0xff]   ;;  %v4366_v2 = vld [vmem:[%s5692_s1 + $0x160] sm:$0xff]   ;;  %v4370_v6 = vld [vmem:[%s5692_s1 + $0x168] sm:$0xff]  }
  0x12   :  { %3895 = vmatprep.subr.bf16.mxu1 %v4335_v18  ;;  %v675_v56 = vcombine.high %v671_v50, %v671_v50  ;;  %2738 = vmatprep.mubr.bf16.mxu1 %v674_v53  ;;  %v4367_v3 = vld [vmem:[%s5692_s1 + $0x120] sm:$0xff]   ;;  %v4371_v7 = vld [vmem:[%s5692_s1 + $0x128] sm:$0xff]   ;;  %v4374_v10 = vld [vmem:[%s5692_s1 + $0x170] sm:$0xff]   ;;  %v657_v18 = vrot.slane %v4791_v43, %v4787_v41 }
  0x13   :  { %3874 = vmatpush3.bf16.msra.mxu0 %v4334_v17  ;;  %v4368_v4 = vld [vmem:[%s5692_s1 + $0x1e0] sm:$0xff]   ;;  %v4372_v8 = vld [vmem:[%s5692_s1 + $0x1e8] sm:$0xff]   ;;  %v4375_v11 = vld [vmem:[%s5692_s1 + $0x130] sm:$0xff]  }
  0x14   :  { %3875 = vmatprep.subr.bf16.mxu0 %v4337_v20  ;;  %v4369_v5 = vld [vmem:[%s5692_s1 + $0x1a0] sm:$0xff]   ;;  %v4373_v9 = vld [vmem:[%s5692_s1 + $0x1a8] sm:$0xff]   ;;  %v4376_v12 = vld [vmem:[%s5692_s1 + $0x1f0] sm:$0xff]  }
  0x15   :  { %3896 = vmatpush3.bf16.msra.mxu1 %v4336_v19  ;;  %v4377_v13 = vld [vmem:[%s5692_s1 + $0x1b0] sm:$0xff]   ;;  %v4378_v14 = vld [vmem:[%s5692_s1 + $0x178] sm:$0xff]   ;;  %v4382_v19 = vld [vmem:[%s5692_s1 + $0x240] sm:$0xff]  }
  0x16   :  { %3897 = vmatprep.subr.bf16.mxu1 %v4339_v22  ;;  %v4379_v15 = vld [vmem:[%s5692_s1 + $0x138] sm:$0xff]   ;;  %v4383_v20 = vld [vmem:[%s5692_s1 + $0x200] sm:$0xff]   ;;  %v4389_v27 = vld [vmem:[%s5692_s1 + $0x288] sm:$0xff]  }
  0x17   :  { %3876 = vmatpush3.bf16.msra.mxu0 %v4338_v21  ;;  %v4380_v16 = vld [vmem:[%s5692_s1 + $0x1f8] sm:$0xff]   ;;  %v4384_v21 = vld [vmem:[%s5692_s1 + $0x2c0] sm:$0xff]   ;;  %v4403_v42 = vld [vmem:[%s5692_s1 + $0x228] sm:$0xff]  }
  0x18   :  { %3877 = vmatprep.subr.bf16.mxu0 %v4341_v24  ;;  %v4381_v17 = vld [vmem:[%s5692_s1 + $0x1b8] sm:$0xff]   ;;  %v4385_v22 = vld [vmem:[%s5692_s1 + $0x280] sm:$0xff]   ;;  %v4386_v24 = vld [vmem:[%s5692_s1 + $0x248] sm:$0xff]  }
  0x19   :  { %3898 = vmatpush3.bf16.msra.mxu1 %v4340_v23  ;;  %v673_v23 = vcombine.high %v657_v18, %v657_v18  ;;  %v4394_v32 = vld [vmem:[%s5692_s1 + $0x258] sm:$0xff]   ;;  %v4398_v36 = vld [vmem:[%s5692_s1 + $0x260] sm:$0xff]   ;;  %v4404_v43 = vld [vmem:[%s5692_s1 + $0x2e8] sm:$0xff]  }
  0x1a   :  { %3899 = vmatprep.subr.bf16.mxu1 %v4343_v26  ;;  %v4388_v26 = vld [vmem:[%s5692_s1 + $0x2c8] sm:$0xff]   ;;  %v4395_v33 = vld [vmem:[%s5692_s1 + $0x218] sm:$0xff]   ;;  %v4400_v38 = vld [vmem:[%s5692_s1 + $0x2e0] sm:$0xff]  }
  0x1b   :  { %3878 = vmatpush3.bf16.msra.mxu0 %v4342_v25  ;;  %v4387_v25 = vld [vmem:[%s5692_s1 + $0x208] sm:$0xff]   ;;  %v4397_v35 = vld [vmem:[%s5692_s1 + $0x298] sm:$0xff]   ;;  %v4401_v39 = vld [vmem:[%s5692_s1 + $0x2a0] sm:$0xff]  }
  0x1c   :  { %3879 = vmatprep.subr.bf16.mxu0 %v4345_v29  ;;  %v4391_v29 = vld [vmem:[%s5692_s1 + $0x210] sm:$0xff]   ;;  %v4405_v44 = vld [vmem:[%s5692_s1 + $0x2a8] sm:$0xff]  }
  0x1d   :  { %3900 = vmatpush3.bf16.msra.mxu1 %v4344_v28  ;;  %v4390_v28 = vld [vmem:[%s5692_s1 + $0x250] sm:$0xff]   ;;  %v23_v46 = vld [vmem:[%s5691_s0 + $0x8] sm:$0xff] }
  0x1e   :  { %3901 = vmatprep.subr.bf16.mxu1 %v4347_v31  ;;  %v4393_v31 = vld [vmem:[%s5692_s1 + $0x290] sm:$0xff]   ;;  %v683_v48 = vrot.slane %v23_v46, %v4787_v41 }
  0x1f   :  { %3880 = vmatpush3.bf16.msra.mxu0 %v4346_v30  ;;  %v4392_v30 = vld [vmem:[%s5692_s1 + $0x2d0] sm:$0xff]  }
  0x20   :  { %3909 = vmatprep.subr.bf16.mxu0 %v4350_v37  ;;  %v4399_v37 = vld [vmem:[%s5692_s1 + $0x220] sm:$0xff]  }
  0x21   :  { %3902 = vmatpush3.bf16.msra.mxu1 %v4349_v34  ;;  %v4396_v34 = vld [vmem:[%s5692_s1 + $0x2d8] sm:$0xff]  }
  0x22   :  { %3931 = vmatprep.subr.bf16.mxu1 %v4352_v40  ;;  %2699 = vmatmul.mubr.bf16.vlgmr.msra.gmra.mrb[0].mxu0 %v650_v45  ;;  %v4402_v40 = vld [vmem:[%s5692_s1 + $0x268] sm:$0xff]   ;;  %v4406_v45 = vld [vmem:[%s5692_s1 + $0x270] sm:$0xff]  }
  0x23   :  { %3910 = vmatpush3.bf16.msra.mxu0 %v4351_v47  ;;  %2778 = vmatprep.mubr.bf16.mxu0 %v671_v50  ;;  %v4407_v47 = vld [vmem:[%s5692_s1 + $0x230] sm:$0xff]  }
  0x24   :  { %2739 = vmatmul.mubr.bf16.vlgmr.msra.gmra.mrb[0].mxu1 %v672_v51  ;;  %3911 = vmatprep.subr.bf16.mxu0 %v4354_v52  ;;  %v4408_v50 = vld [vmem:[%s5692_s1 + $0x2f0] sm:$0xff]   ;;  %v691_v52 = vcombine.high %v683_v48, %v683_v48 }
  0x25   :  { %3932 = vmatpush3.bf16.msra.mxu1 %v4353_v49  ;;  %2818 = vmatprep.mubr.bf16.mxu1 %v675_v56  ;;  %v676_v49 = vcombine.high %v23_v46, %v23_v46  ;;  %v4409_v51 = vld [vmem:[%s5692_s1 + $0x2b0] sm:$0xff]  }
  0x26   :  { %3933 = vmatprep.subr.bf16.mxu1 %v4356_v55  ;;  %v4411_v55 = vld [vmem:[%s5692_s1 + $0x238] sm:$0xff]   ;;  %v713_v56 = vrot.slane %v691_v52, %v4787_v41  ;;  %v4457_v46 = vld [vmem:[%s5692_s1 + $0x4d0] sm:$0xff]   ;;  %v4463_v52 = vld [vmem:[%s5692_s1 + $0x460] sm:$0xff]  }
  0x27   :  { %3912 = vmatpush3.bf16.msra.mxu0 %v4355_v54  ;;  %v4979_v53 = vrot.slane %v676_v49, %v4787_v41  ;;  %v4410_v54 = vld [vmem:[%s5692_s1 + $0x278] sm:$0xff]  }
  0x28   :  { %3913 = vmatprep.subr.bf16.mxu0 %v4358_v58  ;;  %v4412_v58 = vld [vmem:[%s5692_s1 + $0x2f8] sm:$0xff]  }
  0x29   :  { %3934 = vmatpush3.bf16.msra.mxu1 %v4357_v57  ;;  %v692_v57 = vcombine.high %v4979_v53, %v4979_v53  ;;  %v4460_v49 = vld [vmem:[%s5692_s1 + $0x418] sm:$0xff]  }
  0x2a   :  { %3935 = vmatprep.subr.bf16.mxu1 %v4360_v60  ;;  %v723_v60 = vcombine.high %v713_v56, %v713_v56 }
  0x2b   :  { %3914 = vmatpush3.bf16.msra.mxu0 %v4359_v59  ;;  %v4413_v59 = vld [vmem:[%s5692_s1 + $0x2b8] sm:$0xff]  }
  0x2c   :  { %3915 = vmatprep.subr.bf16.mxu0 %v4362_v62  ;;  %v4414_v62 = vld [vmem:[%s5692_s1 + $0x340] sm:$0xff]  }
  0x2d   :  { %3936 = vmatpush3.bf16.msra.mxu1 %v4361_v61  ;;  %v699_v61 = vrot.slane %v683_v48, %v4787_v41  ;;  %v4459_v48 = vld [vmem:[%s5692_s1 + $0x458] sm:$0xff]  }
  0x2e   :  { %3937 = vmatprep.subr.bf16.mxu1 %v4364_v0  ;;  %v720_v0 = vrot.slane %v692_v57, %v4787_v41  ;;  %v4468_v57 = vld [vmem:[%s5692_s1 + $0x428] sm:$0xff]  }
  0x2f   :  { %3916 = vmatpush3.bf16.msra.mxu0 %v4363_v63  ;;  %v4415_v63 = vld [vmem:[%s5692_s1 + $0x300] sm:$0xff]  }
  0x30   :  { %3917 = vmatprep.subr.bf16.mxu0 %v4366_v2  ;;  %v4417_v2 = vld [vmem:[%s5692_s1 + $0x380] sm:$0xff]  }
  0x31   :  { %3938 = vmatpush3.bf16.msra.mxu1 %v4365_v1  ;;  %v4416_v1 = vld [vmem:[%s5692_s1 + $0x3c0] sm:$0xff]  }
  0x32   :  { %3939 = vmatprep.subr.bf16.mxu1 %v4368_v4  ;;  %v4418_v4 = vld [vmem:[%s5692_s1 + $0x348] sm:$0xff]  }
  0x33   :  { %3918 = vmatpush3.bf16.msra.mxu0 %v4367_v3  ;;  %v721_v3 = vcombine.high %v699_v61, %v699_v61 }
  0x34   :  { %3919 = vmatprep.subr.bf16.mxu0 %v4370_v6  ;;  %v724_v6 = vcombine.high %v720_v0, %v720_v0 }
  0x35   :  { %3940 = vmatpush3.bf16.msra.mxu1 %v4369_v5  ;;  %v4419_v5 = vld [vmem:[%s5692_s1 + $0x308] sm:$0xff]  }
  0x36   :  { %3941 = vmatprep.subr.bf16.mxu1 %v4372_v8  ;;  %v4421_v8 = vld [vmem:[%s5692_s1 + $0x388] sm:$0xff]  }
  0x37   :  { %3920 = vmatpush3.bf16.msra.mxu0 %v4371_v7  ;;  %v4420_v7 = vld [vmem:[%s5692_s1 + $0x3c8] sm:$0xff]  }
  0x38   :  { %3921 = vmatprep.subr.bf16.mxu0 %v4374_v10  ;;  %v4423_v10 = vld [vmem:[%s5692_s1 + $0x310] sm:$0xff]  }
  0x39   :  { %3942 = vmatpush3.bf16.msra.mxu1 %v4373_v9  ;;  %v4422_v9 = vld [vmem:[%s5692_s1 + $0x350] sm:$0xff]  }
  0x3a   :  { %3943 = vmatprep.subr.bf16.mxu1 %v4376_v12  ;;  %v4425_v12 = vld [vmem:[%s5692_s1 + $0x390] sm:$0xff]  }
  0x3b   :  { %3922 = vmatpush3.bf16.msra.mxu0 %v4375_v11  ;;  %v4424_v11 = vld [vmem:[%s5692_s1 + $0x3d0] sm:$0xff]  }
  0x3c   :  { %3923 = vmatprep.subr.bf16.mxu0 %v4378_v14  ;;  %v4427_v14 = vld [vmem:[%s5692_s1 + $0x318] sm:$0xff]  }
  0x3d   :  { %3944 = vmatpush3.bf16.msra.mxu1 %v4377_v13  ;;  %v4426_v13 = vld [vmem:[%s5692_s1 + $0x358] sm:$0xff]  }
  0x3e   :  { %3945 = vmatprep.subr.bf16.mxu1 %v4380_v16  ;;  %v4429_v16 = vld [vmem:[%s5692_s1 + $0x398] sm:$0xff]  }
  0x3f   :  { %3924 = vmatpush3.bf16.msra.mxu0 %v4379_v15  ;;  %v4428_v15 = vld [vmem:[%s5692_s1 + $0x3d8] sm:$0xff]  }
  0x40   :  { %3953 = vmatprep.subr.bf16.mxu0 %v4382_v19  ;;  %v4432_v19 = vld [vmem:[%s5692_s1 + $0x3e0] sm:$0xff]  }
  0x41   :  { %3946 = vmatpush3.bf16.msra.mxu1 %v4381_v17  ;;  %v4430_v17 = vld [vmem:[%s5692_s1 + $0x360] sm:$0xff]  }
  0x42   :  { %2779 = vmatmul.mubr.bf16.vlgmr.msra.gmra.mrb[4].mxu0 %v657_v18  ;;  %3975 = vmatprep.subr.bf16.mxu1 %v4384_v21  ;;  %v4431_v18 = vld [vmem:[%s5692_s1 + $0x320] sm:$0xff]   ;;  %v4434_v21 = vld [vmem:[%s5692_s1 + $0x368] sm:$0xff]  }
  0x43   :  { %3954 = vmatpush3.bf16.msra.mxu0 %v4383_v20  ;;  %2858 = vmatprep.mubr.bf16.mxu0 %v713_v56  ;;  %v4433_v20 = vld [vmem:[%s5692_s1 + $0x3a0] sm:$0xff]   ;;  %v4467_v56 = vld [vmem:[%s5692_s1 + $0x468] sm:$0xff]  }
  0x44   :  { %2819 = vmatmul.mubr.bf16.vlgmr.msra.gmra.mrb[4].mxu1 %v673_v23  ;;  %3955 = vmatprep.subr.bf16.mxu0 %v4386_v24  ;;  %v4436_v23 = vld [vmem:[%s5692_s1 + $0x3e8] sm:$0xff]  }
  0x45   :  { %3976 = vmatpush3.bf16.msra.mxu1 %v4385_v22  ;;  %2898 = vmatprep.mubr.bf16.mxu1 %v723_v60  ;;  %v4435_v22 = vld [vmem:[%s5692_s1 + $0x328] sm:$0xff]   ;;  %v4471_v60 = vld [vmem:[%s5692_s1 + $0x470] sm:$0xff]  }
  0x46   :  { %3977 = vmatprep.subr.bf16.mxu1 %v4388_v26  ;;  %v4437_v24 = vld [vmem:[%s5692_s1 + $0x3a8] sm:$0xff]   ;;  %v4439_v26 = vld [vmem:[%s5692_s1 + $0x330] sm:$0xff]  }
  0x47   :  { %3956 = vmatpush3.bf16.msra.mxu0 %v4387_v25  ;;  %v4438_v25 = vld [vmem:[%s5692_s1 + $0x370] sm:$0xff]  }
  0x48   :  { %3957 = vmatprep.subr.bf16.mxu0 %v4390_v28  ;;  %v4441_v28 = vld [vmem:[%s5692_s1 + $0x3b0] sm:$0xff]  }
  0x49   :  { %3978 = vmatpush3.bf16.msra.mxu1 %v4389_v27  ;;  %v4440_v27 = vld [vmem:[%s5692_s1 + $0x3f0] sm:$0xff]  }
  0x4a   :  { %3979 = vmatprep.subr.bf16.mxu1 %v4392_v30  ;;  %v4443_v30 = vld [vmem:[%s5692_s1 + $0x338] sm:$0xff]  }
  0x4b   :  { %3958 = vmatpush3.bf16.msra.mxu0 %v4391_v29  ;;  %v4442_v29 = vld [vmem:[%s5692_s1 + $0x378] sm:$0xff]  }
  0x4c   :  { %3959 = vmatprep.subr.bf16.mxu0 %v4394_v32  ;;  %v4446_v32 = vld [vmem:[%s5692_s1 + $0x3b8] sm:$0xff]  }
  0x4d   :  { %3980 = vmatpush3.bf16.msra.mxu1 %v4393_v31  ;;  %v4444_v31 = vld [vmem:[%s5692_s1 + $0x3f8] sm:$0xff]  }
  0x4e   :  { %3981 = vmatprep.subr.bf16.mxu1 %v4396_v34  ;;  %v4447_v34 = vld [vmem:[%s5692_s1 + $0x440] sm:$0xff]  }
  0x4f   :  { %3960 = vmatpush3.bf16.msra.mxu0 %v4395_v33  ;;  %v706_v33 = vrot.slane %v4979_v53, %v4787_v41  ;;  %v4464_v53 = vld [vmem:[%s5692_s1 + $0x420] sm:$0xff]  }
  0x50   :  { %3961 = vmatprep.subr.bf16.mxu0 %v4398_v36  ;;  %v4449_v36 = vld [vmem:[%s5692_s1 + $0x4c0] sm:$0xff]  }
  0x51   :  { %3982 = vmatpush3.bf16.msra.mxu1 %v4397_v35  ;;  %v4448_v35 = vld [vmem:[%s5692_s1 + $0x400] sm:$0xff]  }
  0x52   :  { %3983 = vmatprep.subr.bf16.mxu1 %v4400_v38  ;;  %v722_v38 = vcombine.high %v706_v33, %v706_v33 }
  0x53   :  { %3962 = vmatpush3.bf16.msra.mxu0 %v4399_v37  ;;  %v4450_v37 = vld [vmem:[%s5692_s1 + $0x480] sm:$0xff]  }
  0x54   :  { %3963 = vmatprep.subr.bf16.mxu0 %v4402_v40  ;;  %v4452_v40 = vld [vmem:[%s5692_s1 + $0x408] sm:$0xff]  }
  0x55   :  { %3984 = vmatpush3.bf16.msra.mxu1 %v4401_v39  ;;  %v4451_v39 = vld [vmem:[%s5692_s1 + $0x448] sm:$0xff]  }
  0x56   :  { %3985 = vmatprep.subr.bf16.mxu1 %v4404_v43  ;;  %v4454_v43 = vld [vmem:[%s5692_s1 + $0x488] sm:$0xff]  }
  0x57   :  { %3964 = vmatpush3.bf16.msra.mxu0 %v4403_v42  ;;  %v4453_v42 = vld [vmem:[%s5692_s1 + $0x4c8] sm:$0xff]  }
  0x58   :  { %3965 = vmatprep.subr.bf16.mxu0 %v4406_v45  ;;  %v4456_v45 = vld [vmem:[%s5692_s1 + $0x410] sm:$0xff]  }
  0x59   :  { %3986 = vmatpush3.bf16.msra.mxu1 %v4405_v44  ;;  %v4455_v44 = vld [vmem:[%s5692_s1 + $0x450] sm:$0xff]  }
  0x5a   :  { %3987 = vmatprep.subr.bf16.mxu1 %v4408_v50  ;;  %v4461_v50 = vld [vmem:[%s5692_s1 + $0x4d8] sm:$0xff]  }
  0x5b   :  { %3966 = vmatpush3.bf16.msra.mxu0 %v4407_v47  ;;  %v4458_v47 = vld [vmem:[%s5692_s1 + $0x490] sm:$0xff]  }
  0x5c   :  { %3967 = vmatprep.subr.bf16.mxu0 %v4410_v54  ;;  %v4465_v54 = vld [vmem:[%s5692_s1 + $0x4e0] sm:$0xff]  }
  0x5d   :  { %3988 = vmatpush3.bf16.msra.mxu1 %v4409_v51  ;;  %v4462_v51 = vld [vmem:[%s5692_s1 + $0x498] sm:$0xff]  }
  0x5e   :  { %3989 = vmatprep.subr.bf16.mxu1 %v4412_v58  ;;  %v4469_v58 = vld [vmem:[%s5692_s1 + $0x4e8] sm:$0xff]  }
  0x5f   :  { %3968 = vmatpush3.bf16.msra.mxu0 %v4411_v55  ;;  %v4466_v55 = vld [vmem:[%s5692_s1 + $0x4a0] sm:$0xff]  }
  0x60   :  { %3997 = vmatprep.subr.bf16.mxu0 %v4414_v62  ;;  %v4472_v62 = vld [vmem:[%s5692_s1 + $0x430] sm:$0xff]  }
  0x61   :  { %3990 = vmatpush3.bf16.msra.mxu1 %v4413_v59  ;;  %v4470_v59 = vld [vmem:[%s5692_s1 + $0x4a8] sm:$0xff]  }
  0x62   :  { %2859 = vmatmul.mubr.bf16.vlgmr.msra.gmra.mrb[8].mxu0 %v699_v61  ;;  %4019 = vmatprep.subr.bf16.mxu1 %v4416_v1  ;;  %v24_v61 = vld [vmem:[%s5691_s0 + $0x10] sm:$0xff] }
  0x63   :  { %3998 = vmatpush3.bf16.msra.mxu0 %v4415_v63  ;;  %2938 = vmatprep.mubr.bf16.mxu0 %v720_v0  ;;  %v732_v63 = vrot.slane %v24_v61, %v4787_v41  ;;  %v725_v0 = vcombine.high %v24_v61, %v24_v61  ;;  %v4473_v1 = vld [vmem:[%s5692_s1 + $0x4f0] sm:$0xff]  }
  0x64   :  { %2899 = vmatmul.mubr.bf16.vlgmr.msra.gmra.mrb[8].mxu1 %v721_v3  ;;  %3999 = vmatprep.subr.bf16.mxu0 %v4418_v4  ;;  %v4522_v61 = vld [vmem:[%s5692_s1 + $0x6d0] sm:$0xff]  }
  0x65   :  { %4020 = vmatpush3.bf16.msra.mxu1 %v4417_v2  ;;  %2978 = vmatprep.mubr.bf16.mxu1 %v724_v6  ;;  %v4474_v2 = vld [vmem:[%s5692_s1 + $0x4b0] sm:$0xff]   ;;  %v740_v3 = vcombine.high %v732_v63, %v732_v63  ;;  %v5185_v4 = vrot.slane %v725_v0, %v4787_v41  ;;  %v4476_v6 = vld [vmem:[%s5692_s1 + $0x438] sm:$0xff]  }
  0x66   :  { %4021 = vmatprep.subr.bf16.mxu1 %v4420_v7  ;;  %v4525_v0 = vld [vmem:[%s5692_s1 + $0x618] sm:$0xff]  }
  0x67   :  { %4000 = vmatpush3.bf16.msra.mxu0 %v4419_v5  ;;  %v4475_v5 = vld [vmem:[%s5692_s1 + $0x478] sm:$0xff]   ;;  %v762_v7 = vrot.slane %v740_v3, %v4787_v41  ;;  %v4528_v3 = vld [vmem:[%s5692_s1 + $0x660] sm:$0xff]  }
  0x68   :  { %4001 = vmatprep.subr.bf16.mxu0 %v4422_v9  ;;  %v4477_v9 = vld [vmem:[%s5692_s1 + $0x4f8] sm:$0xff]  }
  0x69   :  { %4022 = vmatpush3.bf16.msra.mxu1 %v4421_v8  ;;  %v741_v8 = vcombine.high %v5185_v4, %v5185_v4 }
  0x6a   :  { %4023 = vmatprep.subr.bf16.mxu1 %v4424_v11  ;;  %v772_v11 = vcombine.high %v762_v7, %v762_v7 }
  0x6b   :  { %4002 = vmatpush3.bf16.msra.mxu0 %v4423_v10  ;;  %v4478_v10 = vld [vmem:[%s5692_s1 + $0x4b8] sm:$0xff]  }
  0x6c   :  { %4003 = vmatprep.subr.bf16.mxu0 %v4426_v13  ;;  %v4479_v13 = vld [vmem:[%s5692_s1 + $0x540] sm:$0xff]  }
  0x6d   :  { %4024 = vmatpush3.bf16.msra.mxu1 %v4425_v12  ;;  %v748_v12 = vrot.slane %v732_v63, %v4787_v41  ;;  %v4524_v63 = vld [vmem:[%s5692_s1 + $0x658] sm:$0xff]  }
  0x6e   :  { %4025 = vmatprep.subr.bf16.mxu1 %v4428_v15  ;;  %v769_v15 = vrot.slane %v741_v8, %v4787_v41  ;;  %v4533_v8 = vld [vmem:[%s5692_s1 + $0x628] sm:$0xff]  }
  0x6f   :  { %4004 = vmatpush3.bf16.msra.mxu0 %v4427_v14  ;;  %v4480_v14 = vld [vmem:[%s5692_s1 + $0x500] sm:$0xff]  }
  0x70   :  { %4005 = vmatprep.subr.bf16.mxu0 %v4430_v17  ;;  %v4482_v17 = vld [vmem:[%s5692_s1 + $0x580] sm:$0xff]  }
  0x71   :  { %4026 = vmatpush3.bf16.msra.mxu1 %v4429_v16  ;;  %v4481_v16 = vld [vmem:[%s5692_s1 + $0x5c0] sm:$0xff]  }
  0x72   :  { %4027 = vmatprep.subr.bf16.mxu1 %v4432_v19  ;;  %v4483_v19 = vld [vmem:[%s5692_s1 + $0x548] sm:$0xff]  }
  0x73   :  { %4006 = vmatpush3.bf16.msra.mxu0 %v4431_v18  ;;  %v770_v18 = vcombine.high %v748_v12, %v748_v12 }
  0x74   :  { %4007 = vmatprep.subr.bf16.mxu0 %v4434_v21  ;;  %v773_v21 = vcombine.high %v769_v15, %v769_v15 }
  0x75   :  { %4028 = vmatpush3.bf16.msra.mxu1 %v4433_v20  ;;  %v4484_v20 = vld [vmem:[%s5692_s1 + $0x508] sm:$0xff]  }
  0x76   :  { %4029 = vmatprep.subr.bf16.mxu1 %v4436_v23  ;;  %v4486_v23 = vld [vmem:[%s5692_s1 + $0x588] sm:$0xff]  }
  0x77   :  { %4008 = vmatpush3.bf16.msra.mxu0 %v4435_v22  ;;  %v4485_v22 = vld [vmem:[%s5692_s1 + $0x5c8] sm:$0xff]  }
  0x78   :  { %4009 = vmatprep.subr.bf16.mxu0 %v4438_v25  ;;  %v4488_v25 = vld [vmem:[%s5692_s1 + $0x510] sm:$0xff]  }
  0x79   :  { %4030 = vmatpush3.bf16.msra.mxu1 %v4437_v24  ;;  %v4487_v24 = vld [vmem:[%s5692_s1 + $0x550] sm:$0xff]  }
  0x7a   :  { %4031 = vmatprep.subr.bf16.mxu1 %v4440_v27  ;;  %v4490_v27 = vld [vmem:[%s5692_s1 + $0x590] sm:$0xff]  }
  0x7b   :  { %4010 = vmatpush3.bf16.msra.mxu0 %v4439_v26  ;;  %v4489_v26 = vld [vmem:[%s5692_s1 + $0x5d0] sm:$0xff]  }
  0x7c   :  { %4011 = vmatprep.subr.bf16.mxu0 %v4442_v29  ;;  %v4492_v29 = vld [vmem:[%s5692_s1 + $0x518] sm:$0xff]  }
  0x7d   :  { %4032 = vmatpush3.bf16.msra.mxu1 %v4441_v28  ;;  %v4491_v28 = vld [vmem:[%s5692_s1 + $0x558] sm:$0xff]  }
  0x7e   :  { %4033 = vmatprep.subr.bf16.mxu1 %v4444_v31  ;;  %v4494_v31 = vld [vmem:[%s5692_s1 + $0x598] sm:$0xff]  }
  0x7f   :  { %4012 = vmatpush3.bf16.msra.mxu0 %v4443_v30  ;;  %v4493_v30 = vld [vmem:[%s5692_s1 + $0x5d8] sm:$0xff]  }
  0x80   :  { %4041 = vmatprep.subr.bf16.mxu0 %v4447_v34  ;;  %v4497_v34 = vld [vmem:[%s5692_s1 + $0x5e0] sm:$0xff]  }
  0x81   :  { %4034 = vmatpush3.bf16.msra.mxu1 %v4446_v32  ;;  %v4495_v32 = vld [vmem:[%s5692_s1 + $0x560] sm:$0xff]  }
  0x82   :  { %2939 = vmatmul.mubr.bf16.vlgmr.msra.gmra.mrb[12].mxu0 %v706_v33  ;;  %4063 = vmatprep.subr.bf16.mxu1 %v4449_v36  ;;  %v4496_v33 = vld [vmem:[%s5692_s1 + $0x520] sm:$0xff]   ;;  %v4499_v36 = vld [vmem:[%s5692_s1 + $0x568] sm:$0xff]  }
  0x83   :  { %4042 = vmatpush3.bf16.msra.mxu0 %v4448_v35  ;;  %3018 = vmatprep.mubr.bf16.mxu0 %v762_v7  ;;  %v4498_v35 = vld [vmem:[%s5692_s1 + $0x5a0] sm:$0xff]   ;;  %v4532_v7 = vld [vmem:[%s5692_s1 + $0x668] sm:$0xff]  }
  0x84   :  { %2979 = vmatmul.mubr.bf16.vlgmr.msra.gmra.mrb[12].mxu1 %v722_v38  ;;  %4043 = vmatprep.subr.bf16.mxu0 %v4451_v39  ;;  %v4501_v38 = vld [vmem:[%s5692_s1 + $0x5e8] sm:$0xff]  }
  0x85   :  { %4064 = vmatpush3.bf16.msra.mxu1 %v4450_v37  ;;  %3058 = vmatprep.mubr.bf16.mxu1 %v772_v11  ;;  %v4500_v37 = vld [vmem:[%s5692_s1 + $0x528] sm:$0xff]   ;;  %v4536_v11 = vld [vmem:[%s5692_s1 + $0x670] sm:$0xff]  }
  0x86   :  { %4065 = vmatprep.subr.bf16.mxu1 %v4453_v42  ;;  %v4502_v39 = vld [vmem:[%s5692_s1 + $0x5a8] sm:$0xff]   ;;  %v4504_v42 = vld [vmem:[%s5692_s1 + $0x530] sm:$0xff]  }
  0x87   :  { %4044 = vmatpush3.bf16.msra.mxu0 %v4452_v40  ;;  %v4503_v40 = vld [vmem:[%s5692_s1 + $0x570] sm:$0xff]  }
  0x88   :  { %4045 = vmatprep.subr.bf16.mxu0 %v4455_v44  ;;  %v4506_v44 = vld [vmem:[%s5692_s1 + $0x5b0] sm:$0xff]  }
  0x89   :  { %4066 = vmatpush3.bf16.msra.mxu1 %v4454_v43  ;;  %v4505_v43 = vld [vmem:[%s5692_s1 + $0x5f0] sm:$0xff]  }
  0x8a   :  { %4067 = vmatprep.subr.bf16.mxu1 %v4457_v46  ;;  %v4508_v46 = vld [vmem:[%s5692_s1 + $0x538] sm:$0xff]  }
  0x8b   :  { %4046 = vmatpush3.bf16.msra.mxu0 %v4456_v45  ;;  %v4507_v45 = vld [vmem:[%s5692_s1 + $0x578] sm:$0xff]  }
  0x8c   :  { %4047 = vmatprep.subr.bf16.mxu0 %v4459_v48  ;;  %v4511_v48 = vld [vmem:[%s5692_s1 + $0x5b8] sm:$0xff]  }
  0x8d   :  { %4068 = vmatpush3.bf16.msra.mxu1 %v4458_v47  ;;  %v4509_v47 = vld [vmem:[%s5692_s1 + $0x5f8] sm:$0xff]  }
  0x8e   :  { %4069 = vmatprep.subr.bf16.mxu1 %v4461_v50  ;;  %v4512_v50 = vld [vmem:[%s5692_s1 + $0x640] sm:$0xff]  }
  0x8f   :  { %4048 = vmatpush3.bf16.msra.mxu0 %v4460_v49  ;;  %v755_v49 = vrot.slane %v5185_v4, %v4787_v41  ;;  %v4529_v4 = vld [vmem:[%s5692_s1 + $0x620] sm:$0xff]  }
  0x90   :  { %4049 = vmatprep.subr.bf16.mxu0 %v4463_v52  ;;  %v4514_v52 = vld [vmem:[%s5692_s1 + $0x6c0] sm:$0xff]  }
  0x91   :  { %4070 = vmatpush3.bf16.msra.mxu1 %v4462_v51  ;;  %v4513_v51 = vld [vmem:[%s5692_s1 + $0x600] sm:$0xff]  }
  0x92   :  { %4071 = vmatprep.subr.bf16.mxu1 %v4465_v54  ;;  %v771_v54 = vcombine.high %v755_v49, %v755_v49 }
  0x93   :  { %4050 = vmatpush3.bf16.msra.mxu0 %v4464_v53  ;;  %v4515_v53 = vld [vmem:[%s5692_s1 + $0x680] sm:$0xff]  }
  0x94   :  { %4051 = vmatprep.subr.bf16.mxu0 %v4467_v56  ;;  %v4517_v56 = vld [vmem:[%s5692_s1 + $0x608] sm:$0xff]  }
  0x95   :  { %4072 = vmatpush3.bf16.msra.mxu1 %v4466_v55  ;;  %v4516_v55 = vld [vmem:[%s5692_s1 + $0x648] sm:$0xff]  }
  0x96   :  { %4073 = vmatprep.subr.bf16.mxu1 %v4469_v58  ;;  %v4519_v58 = vld [vmem:[%s5692_s1 + $0x688] sm:$0xff]  }
  0x97   :  { %4052 = vmatpush3.bf16.msra.mxu0 %v4468_v57  ;;  %v4518_v57 = vld [vmem:[%s5692_s1 + $0x6c8] sm:$0xff]  }
  0x98   :  { %4053 = vmatprep.subr.bf16.mxu0 %v4471_v60  ;;  %v4521_v60 = vld [vmem:[%s5692_s1 + $0x610] sm:$0xff]  }
  0x99   :  { %4074 = vmatpush3.bf16.msra.mxu1 %v4470_v59  ;;  %v4520_v59 = vld [vmem:[%s5692_s1 + $0x650] sm:$0xff]  }
  0x9a   :  { %4075 = vmatprep.subr.bf16.mxu1 %v4473_v1  ;;  %v4526_v1 = vld [vmem:[%s5692_s1 + $0x6d8] sm:$0xff]  }
  0x9b   :  { %4054 = vmatpush3.bf16.msra.mxu0 %v4472_v62  ;;  %v4523_v62 = vld [vmem:[%s5692_s1 + $0x690] sm:$0xff]  }
  0x9c   :  { %4055 = vmatprep.subr.bf16.mxu0 %v4475_v5  ;;  %v4530_v5 = vld [vmem:[%s5692_s1 + $0x6e0] sm:$0xff]  }
  0x9d   :  { %4076 = vmatpush3.bf16.msra.mxu1 %v4474_v2  ;;  %v4527_v2 = vld [vmem:[%s5692_s1 + $0x698] sm:$0xff]  }
  0x9e   :  { %4077 = vmatprep.subr.bf16.mxu1 %v4477_v9  ;;  %v4534_v9 = vld [vmem:[%s5692_s1 + $0x6e8] sm:$0xff]  }
  0x9f   :  { %4056 = vmatpush3.bf16.msra.mxu0 %v4476_v6  ;;  %v4531_v6 = vld [vmem:[%s5692_s1 + $0x6a0] sm:$0xff]  }
  0xa0   :  { %4085 = vmatprep.subr.bf16.mxu0 %v4479_v13  ;;  %v4538_v13 = vld [vmem:[%s5692_s1 + $0x6f0] sm:$0xff]  }
  0xa1   :  { %4078 = vmatpush3.bf16.msra.mxu1 %v4478_v10  ;;  %v4535_v10 = vld [vmem:[%s5692_s1 + $0x6a8] sm:$0xff]  }
  0xa2   :  { %3019 = vmatmul.mubr.bf16.vlgmr.msra.gmra.mrb[16].mxu0 %v748_v12  ;;  %4107 = vmatprep.subr.bf16.mxu1 %v4481_v16  ;;  %v25_v12 = vld [vmem:[%s5691_s0 + $0x18] sm:$0xff]  ;;  %v4537_v16 = vld [vmem:[%s5692_s1 + $0x630] sm:$0xff]  }
  0xa3   :  { %4086 = vmatpush3.bf16.msra.mxu0 %v4480_v14  ;;  %3098 = vmatprep.mubr.bf16.mxu0 %v769_v15  ;;  %v781_v14 = vrot.slane %v25_v12, %v4787_v41  ;;  %v774_v15 = vcombine.high %v25_v12, %v25_v12  ;;  %v4576_v12 = vld [vmem:[%s5692_s1 + $0x7b8] sm:$0xff]  }
  0xa4   :  { %3059 = vmatmul.mubr.bf16.vlgmr.msra.gmra.mrb[16].mxu1 %v770_v18  ;;  %4087 = vmatprep.subr.bf16.mxu0 %v4483_v19 }
  0xa5   :  { %4108 = vmatpush3.bf16.msra.mxu1 %v4482_v17  ;;  %3138 = vmatprep.mubr.bf16.mxu1 %v773_v21  ;;  %v4540_v17 = vld [vmem:[%s5692_s1 + $0x678] sm:$0xff]   ;;  %v789_v18 = vcombine.high %v781_v14, %v781_v14  ;;  %v5391_v19 = vrot.slane %v774_v15, %v4787_v41  ;;  %v4578_v15 = vld [vmem:[%s5692_s1 + $0x800] sm:$0xff]  }
  0xa6   :  { %4109 = vmatprep.subr.bf16.mxu1 %v4485_v22  ;;  %v4542_v21 = vld [vmem:[%s5692_s1 + $0x6f8] sm:$0xff]  }
  0xa7   :  { %4088 = vmatpush3.bf16.msra.mxu0 %v4484_v20  ;;  %v4539_v20 = vld [vmem:[%s5692_s1 + $0x6b0] sm:$0xff]   ;;  %v811_v22 = vrot.slane %v789_v18, %v4787_v41 }
  0xa8   :  { %4089 = vmatprep.subr.bf16.mxu0 %v4487_v24  ;;  %v4541_v24 = vld [vmem:[%s5692_s1 + $0x638] sm:$0xff]  }
  0xa9   :  { %4110 = vmatpush3.bf16.msra.mxu1 %v4486_v23  ;;  %v790_v23 = vcombine.high %v5391_v19, %v5391_v19 }
  0xaa   :  { %4111 = vmatprep.subr.bf16.mxu1 %v4489_v26  ;;  %v4544_v26 = vld [vmem:[%s5692_s1 + $0x740] sm:$0xff]  }
  0xab   :  { %4090 = vmatpush3.bf16.msra.mxu0 %v4488_v25  ;;  %v797_v25 = vrot.slane %v781_v14, %v4787_v41  ;;  %v4577_v14 = vld [vmem:[%s5692_s1 + $0x840] sm:$0xff]  }
  0xac   :  { %4091 = vmatprep.subr.bf16.mxu0 %v4491_v28  ;;  %v4543_v28 = vld [vmem:[%s5692_s1 + $0x6b8] sm:$0xff]  }
  0xad   :  { %4112 = vmatpush3.bf16.msra.mxu1 %v4490_v27  ;;  %v821_v27 = vcombine.high %v811_v22, %v811_v22 }
  0xae   :  { %4113 = vmatprep.subr.bf16.mxu1 %v4493_v30  ;;  %v4546_v30 = vld [vmem:[%s5692_s1 + $0x7c0] sm:$0xff]  }
  0xaf   :  { %4092 = vmatpush3.bf16.msra.mxu0 %v4492_v29  ;;  %v818_v29 = vrot.slane %v790_v23, %v4787_v41  ;;  %v4585_v23 = vld [vmem:[%s5692_s1 + $0x850] sm:$0xff]  }
  0xb0   :  { %4093 = vmatprep.subr.bf16.mxu0 %v4495_v32  ;;  %v819_v32 = vcombine.high %v797_v25, %v797_v25 }
  0xb1   :  { %4114 = vmatpush3.bf16.msra.mxu1 %v4494_v31  ;;  %v4545_v31 = vld [vmem:[%s5692_s1 + $0x700] sm:$0xff]  }
  0xb2   :  { %4115 = vmatprep.subr.bf16.mxu1 %v4497_v34  ;;  %v4547_v34 = vld [vmem:[%s5692_s1 + $0x780] sm:$0xff]  }
  0xb3   :  { %4094 = vmatpush3.bf16.msra.mxu0 %v4496_v33  ;;  %v4548_v33 = vld [vmem:[%s5692_s1 + $0x748] sm:$0xff]  }
  0xb4   :  { %4095 = vmatprep.subr.bf16.mxu0 %v4499_v36  ;;  %v4550_v36 = vld [vmem:[%s5692_s1 + $0x7c8] sm:$0xff]  }
  0xb5   :  { %4116 = vmatpush3.bf16.msra.mxu1 %v4498_v35  ;;  %v822_v35 = vcombine.high %v818_v29, %v818_v29 }
  0xb6   :  { %4117 = vmatprep.subr.bf16.mxu1 %v4501_v38  ;;  %v4552_v38 = vld [vmem:[%s5692_s1 + $0x750] sm:$0xff]  }
  0xb7   :  { %4096 = vmatpush3.bf16.msra.mxu0 %v4500_v37  ;;  %v4549_v37 = vld [vmem:[%s5692_s1 + $0x708] sm:$0xff]  }
  0xb8   :  { %4097 = vmatprep.subr.bf16.mxu0 %v4503_v40  ;;  %v4554_v40 = vld [vmem:[%s5692_s1 + $0x7d0] sm:$0xff]  }
  0xb9   :  { %4118 = vmatpush3.bf16.msra.mxu1 %v4502_v39  ;;  %v4551_v39 = vld [vmem:[%s5692_s1 + $0x788] sm:$0xff]  }
  0xba   :  { %4119 = vmatprep.subr.bf16.mxu1 %v4505_v43  ;;  %v4556_v43 = vld [vmem:[%s5692_s1 + $0x758] sm:$0xff]  }
  0xbb   :  { %4098 = vmatpush3.bf16.msra.mxu0 %v4504_v42  ;;  %v4553_v42 = vld [vmem:[%s5692_s1 + $0x710] sm:$0xff]  }
  0xbc   :  { %4099 = vmatprep.subr.bf16.mxu0 %v4507_v45  ;;  %v4557_v45 = vld [vmem:[%s5692_s1 + $0x718] sm:$0xff]  }
  0xbd   :  { %4120 = vmatpush3.bf16.msra.mxu1 %v4506_v44  ;;  %v4555_v44 = vld [vmem:[%s5692_s1 + $0x790] sm:$0xff]  }
  0xbe   :  { %4121 = vmatprep.subr.bf16.mxu1 %v4509_v47  ;;  %v4559_v47 = vld [vmem:[%s5692_s1 + $0x798] sm:$0xff]  }
  0xbf   :  { %4100 = vmatpush3.bf16.msra.mxu0 %v4508_v46  ;;  %v4558_v46 = vld [vmem:[%s5692_s1 + $0x7d8] sm:$0xff]  }
  0xc0   :  { %4129 = vmatprep.subr.bf16.mxu0 %v4512_v50  ;;  %v4562_v50 = vld [vmem:[%s5692_s1 + $0x7e0] sm:$0xff]  }
  0xc1   :  { %4122 = vmatpush3.bf16.msra.mxu1 %v4511_v48  ;;  %v4560_v48 = vld [vmem:[%s5692_s1 + $0x760] sm:$0xff]  }
  0xc2   :  { %3099 = vmatmul.mubr.bf16.vlgmr.msra.gmra.mrb[20].mxu0 %v755_v49  ;;  %4151 = vmatprep.subr.bf16.mxu1 %v4514_v52  ;;  %v4561_v49 = vld [vmem:[%s5692_s1 + $0x720] sm:$0xff]   ;;  %v4564_v52 = vld [vmem:[%s5692_s1 + $0x768] sm:$0xff]  }
  0xc3   :  { %4130 = vmatpush3.bf16.msra.mxu0 %v4513_v51  ;;  %3178 = vmatprep.mubr.bf16.mxu0 %v811_v22  ;;  %v4563_v51 = vld [vmem:[%s5692_s1 + $0x7a0] sm:$0xff]   ;;  %v4584_v22 = vld [vmem:[%s5692_s1 + $0x888] sm:$0xff]  }
  0xc4   :  { %3139 = vmatmul.mubr.bf16.vlgmr.msra.gmra.mrb[20].mxu1 %v771_v54  ;;  %4131 = vmatprep.subr.bf16.mxu0 %v4516_v55  ;;  %v4566_v54 = vld [vmem:[%s5692_s1 + $0x7e8] sm:$0xff]  }
  0xc5   :  { %4152 = vmatpush3.bf16.msra.mxu1 %v4515_v53  ;;  %3218 = vmatprep.mubr.bf16.mxu1 %v821_v27  ;;  %v4565_v53 = vld [vmem:[%s5692_s1 + $0x728] sm:$0xff]   ;;  %v4589_v27 = vld [vmem:[%s5692_s1 + $0x858] sm:$0xff]  }
  0xc6   :  { %4153 = vmatprep.subr.bf16.mxu1 %v4518_v57  ;;  %v4567_v55 = vld [vmem:[%s5692_s1 + $0x7a8] sm:$0xff]   ;;  %v4568_v57 = vld [vmem:[%s5692_s1 + $0x770] sm:$0xff]  }
  0xc7   :  { %4132 = vmatpush3.bf16.msra.mxu0 %v4517_v56  ;;  %v3559_v56 = vld [vmem:[%s5693_s2] ss:$0 sm:$0xff] }
  0xc8   :  { %4133 = vmatprep.subr.bf16.mxu0 %v4520_v59  ;;  %v4569_v59 = vld [vmem:[%s5692_s1 + $0x730] sm:$0xff]  }
  0xc9   :  { %4154 = vmatpush3.bf16.msra.mxu1 %v4519_v58 }
  0xca   :  { %4155 = vmatprep.subr.bf16.mxu1 %v4522_v61  ;;  %v4570_v61 = vld [vmem:[%s5692_s1 + $0x7f0] sm:$0xff]  }
  0xcb   :  { %4134 = vmatpush3.bf16.msra.mxu0 %v4521_v60 }
  0xcc   :  { %4135 = vmatprep.subr.bf16.mxu0 %v4524_v63 }
  0xcd   :  { %4156 = vmatpush3.bf16.msra.mxu1 %v4523_v62 }
  0xce   :  { %4157 = vmatprep.subr.bf16.mxu1 %v4526_v1  ;;  %v4571_v1 = vld [vmem:[%s5692_s1 + $0x7b0] sm:$0xff]  }
  0xcf   :  { %4136 = vmatpush3.bf16.msra.mxu0 %v4525_v0 }
  0xd0   :  { %4137 = vmatprep.subr.bf16.mxu0 %v4528_v3 }
  0xd1   :  { %4158 = vmatpush3.bf16.msra.mxu1 %v4527_v2  ;;  %v4572_v2 = vld [vmem:[%s5692_s1 + $0x778] sm:$0xff]  }
  0xd2   :  { %4159 = vmatprep.subr.bf16.mxu1 %v4530_v5 }
  0xd3   :  { %4138 = vmatpush3.bf16.msra.mxu0 %v4529_v4 }
  0xd4   :  { %4139 = vmatprep.subr.bf16.mxu0 %v4532_v7  ;;  %v4573_v7 = vld [vmem:[%s5692_s1 + $0x738] sm:$0xff]  }
  0xd5   :  { %4160 = vmatpush3.bf16.msra.mxu1 %v4531_v6 }
  0xd6   :  { %4161 = vmatprep.subr.bf16.mxu1 %v4534_v9  ;;  %v4574_v9 = vld [vmem:[%s5692_s1 + $0x7f8] sm:$0xff]  }
  0xd7   :  { %4140 = vmatpush3.bf16.msra.mxu0 %v4533_v8 }
  0xd8   :  { %4141 = vmatprep.subr.bf16.mxu0 %v4536_v11 }
  0xd9   :  { %4162 = vmatpush3.bf16.msra.mxu1 %v4535_v10 }
  0xda   :  { %4163 = vmatprep.subr.bf16.mxu1 %v4538_v13  ;;  %v804_v13 = vrot.slane %v5391_v19, %v4787_v41  ;;  %v4581_v19 = vld [vmem:[%s5692_s1 + $0x848] sm:$0xff]  }
  0xdb   :  { %4142 = vmatpush3.bf16.msra.mxu0 %v4537_v16  ;;  %v4579_v16 = vld [vmem:[%s5692_s1 + $0x8c0] sm:$0xff]  }
  0xdc   :  { %4143 = vmatprep.subr.bf16.mxu0 %v4540_v17  ;;  %v4580_v17 = vld [vmem:[%s5692_s1 + $0x880] sm:$0xff]   ;;  %v820_v18 = vcombine.high %v804_v13, %v804_v13 }
  0xdd   :  { %4164 = vmatpush3.bf16.msra.mxu1 %v4539_v20  ;;  %v4582_v20 = vld [vmem:[%s5692_s1 + $0x808] sm:$0xff]  }
  0xde   :  { %4165 = vmatprep.subr.bf16.mxu1 %v4542_v21  ;;  %v4583_v21 = vld [vmem:[%s5692_s1 + $0x8c8] sm:$0xff]  }
  0xdf   :  { %4144 = vmatpush3.bf16.msra.mxu0 %v4541_v24  ;;  %v4586_v24 = vld [vmem:[%s5692_s1 + $0x810] sm:$0xff]  }
  0xe0   :  { %4173 = vmatprep.subr.bf16.mxu0 %v4544_v26  ;;  %v4588_v26 = vld [vmem:[%s5692_s1 + $0x890] sm:$0xff]  }
  0xe1   :  { %4166 = vmatpush3.bf16.msra.mxu1 %v4543_v28  ;;  %v4590_v28 = vld [vmem:[%s5692_s1 + $0x818] sm:$0xff]  }
  0xe2   :  { %3179 = vmatmul.mubr.bf16.vlgmr.msra.gmra.mrb[24].mxu0 %v797_v25  ;;  %4195 = vmatprep.subr.bf16.mxu1 %v4546_v30  ;;  %v4587_v25 = vld [vmem:[%s5692_s1 + $0x8d0] sm:$0xff]   ;;  %v4592_v30 = vld [vmem:[%s5692_s1 + $0x898] sm:$0xff]  }
  0xe3   :  { %4174 = vmatpush3.bf16.msra.mxu0 %v4545_v31  ;;  %3258 = vmatprep.mubr.bf16.mxu0 %v818_v29  ;;  %v4591_v29 = vld [vmem:[%s5692_s1 + $0x8d8] sm:$0xff]   ;;  %v4593_v31 = vld [vmem:[%s5692_s1 + $0x860] sm:$0xff]  }
  0xe4   :  { %3219 = vmatmul.mubr.bf16.vlgmr.msra.gmra.mrb[24].mxu1 %v819_v32  ;;  %4175 = vmatprep.subr.bf16.mxu0 %v4548_v33  ;;  %v4594_v32 = vld [vmem:[%s5692_s1 + $0x820] sm:$0xff]  }
  0xe5   :  { %4196 = vmatpush3.bf16.msra.mxu1 %v4547_v34  ;;  %3298 = vmatprep.mubr.bf16.mxu1 %v822_v35  ;;  %v4595_v33 = vld [vmem:[%s5692_s1 + $0x8e0] sm:$0xff]   ;;  %v4597_v35 = vld [vmem:[%s5692_s1 + $0x868] sm:$0xff]  }
  0xe6   :  { %4197 = vmatprep.subr.bf16.mxu1 %v4550_v36  ;;  %v4596_v34 = vld [vmem:[%s5692_s1 + $0x8a0] sm:$0xff]   ;;  %v4598_v36 = vld [vmem:[%s5692_s1 + $0x828] sm:$0xff]  }
  0xe7   :  { %4176 = vmatpush3.bf16.msra.mxu0 %v4549_v37  ;;  %v4599_v37 = vld [vmem:[%s5692_s1 + $0x8e8] sm:$0xff]  }
  0xe8   :  { %4177 = vmatprep.subr.bf16.mxu0 %v4552_v38  ;;  %v4600_v38 = vld [vmem:[%s5692_s1 + $0x8a8] sm:$0xff]  }
  0xe9   :  { %4198 = vmatpush3.bf16.msra.mxu1 %v4551_v39  ;;  %v4601_v39 = vld [vmem:[%s5692_s1 + $0x870] sm:$0xff]  }
  0xea   :  { %4199 = vmatprep.subr.bf16.mxu1 %v4554_v40 }
  0xeb   :  { %4178 = vmatpush3.bf16.msra.mxu0 %v4553_v42  ;;  %v4602_v42 = vld [vmem:[%s5692_s1 + $0x830] sm:$0xff]  }
  0xec   :  { %4179 = vmatprep.subr.bf16.mxu0 %v4556_v43 }
  0xed   :  { %4200 = vmatpush3.bf16.msra.mxu1 %v4555_v44  ;;  %v4603_v44 = vld [vmem:[%s5692_s1 + $0x8f0] sm:$0xff]  }
  0xee   :  { %4201 = vmatprep.subr.bf16.mxu1 %v4558_v46 }
  0xef   :  { %4180 = vmatpush3.bf16.msra.mxu0 %v4557_v45  ;;  %v26_v45 = vld [vmem:[%s5691_s0 + $0x20] sm:$0x1f] }
  0xf0   :  { %4181 = vmatprep.subr.bf16.mxu0 %v4560_v48 }
  0xf1   :  { %4202 = vmatpush3.bf16.msra.mxu1 %v4559_v47 }
  0xf2   :  { %4203 = vmatprep.subr.bf16.mxu1 %v4562_v50 }
  0xf3   :  { %4182 = vmatpush3.bf16.msra.mxu0 %v4561_v49  ;;  %v830_v49 = vrot.slane %v26_v45, %v4787_v41 }
  0xf4   :  { %4183 = vmatprep.subr.bf16.mxu0 %v4564_v52  ;;  %v4604_v52 = vld [vmem:[%s5692_s1 + $0x8b0] sm:$0xff]  }
  0xf5   :  { %v3881_v58 = vpop.f32.mrb[0].mxu0  ;;  %4204 = vmatpush3.bf16.msra.mxu1 %v4563_v51 }
  0xf6   :  { %v3882_v60 = vpop.f32.mrb[1].mxu0  ;;  %4205 = vmatprep.subr.bf16.mxu1 %v4566_v54 }
  0xf7   :  { %v3883_v62 = vadd.f32 %v3882_v60, %v3881_v58  ;;  %v3884_v63 = vpop.f32.mrb[2].mxu0  ;;  %v3903_v0 = vpop.f32.mrb[0].mxu1  ;;  %4184 = vmatpush3.bf16.msra.mxu0 %v4565_v53  ;;  %v4605_v53 = vld [vmem:[%s5692_s1 + $0x878] sm:$0xff]  }
  0xf8   :  { %v3885_v3 = vpop.f32.mrb[3].mxu0  ;;  %v3904_v4 = vpop.f32.mrb[1].mxu1  ;;  %4185 = vmatprep.subr.bf16.mxu0 %v4568_v57  ;;  %v838_v57 = vcombine.high %v830_v49, %v830_v49  ;;  %v4609_v63 = vld [vmem:[%s5692_s1 + $0x8b8] sm:$0xff]  }
  0xf9   :  { %v2701_v5 = vadd.f32 %v3883_v62, %v3559_v56  ;;  %v3905_v6 = vadd.f32 %v3904_v4, %v3903_v0  ;;  %4206 = vmatpush3.bf16.msra.mxu1 %v4567_v55  ;;  %v3906_v8 = vpop.f32.mrb[2].mxu1  ;;  %v4606_v56 = vld [vmem:[%s5692_s1 + $0x838] sm:$0xff]   ;;  %v845_v0 = vrot.slane %v830_v49, %v4787_v41  ;;  %v4649_v3 = vmov 0.0  }
  0xfa   :  { %4207 = vmatprep.subr.bf16.mxu1 %v4570_v61  ;;  %v3907_v10 = vpop.f32.mrb[3].mxu1  ;;  %v859_v62 = vrot.slane %v838_v57, %v4787_v41 }
  0xfb   :  { %v5506_v11 = vadd.f32 %v3905_v6, %v2701_v5  ;;  %4186 = vmatpush3.bf16.msra.mxu0 %v4569_v59  ;;  %v4607_v59 = vld [vmem:[%s5692_s1 + $0x8f8] sm:$0xff]   ;;  %v860_v4 = vcombine.high %v845_v0, %v845_v0 }
  0xfc   :  { %4187 = vmatprep.subr.bf16.mxu0 %v4572_v2  ;;  %v4610_v2 = vld [vmem:[%s5692_s1 + $0x900] sm:$0xff]  }
  0xfd   :  { %4208 = vmatpush3.bf16.msra.mxu1 %v4571_v1  ;;  %v861_v1 = vcombine.high %v859_v62, %v859_v62 }
  0xfe   :  { %4209 = vmatprep.subr.bf16.mxu1 %v4574_v9 }
  0xff   :  { %4188 = vmatpush3.bf16.msra.mxu0 %v4573_v7 }
 0x100   :  { %4217 = vmatprep.subr.bf16.mxu0 %v4577_v14 }
 0x101   :  { %4210 = vmatpush3.bf16.msra.mxu1 %v4576_v12 }
 0x102   :  { %3259 = vmatmul.mubr.bf16.vlgmr.msra.gmra.mrb[28].mxu0 %v804_v13  ;;  %4239 = vmatprep.subr.bf16.mxu1 %v4579_v16 }
 0x103   :  { %4218 = vmatpush3.bf16.msra.mxu0 %v4578_v15  ;;  %3338 = vmatprep.mubr.bf16.mxu0 %v859_v62 }
 0x104   :  { %3299 = vmatmul.mubr.bf16.vlgmr.msra.gmra.mrb[28].mxu1 %v820_v18  ;;  %4219 = vmatprep.subr.bf16.mxu0 %v4581_v19 }
 0x105   :  { %4240 = vmatpush3.bf16.msra.mxu1 %v4580_v17  ;;  %3378 = vmatprep.mubr.bf16.mxu1 %v861_v1 }
 0x106   :  { %4241 = vmatprep.subr.bf16.mxu1 %v4583_v21 }
 0x107   :  { %4220 = vmatpush3.bf16.msra.mxu0 %v4582_v20 }
 0x108   :  { %4221 = vmatprep.subr.bf16.mxu0 %v4585_v23 }
 0x109   :  { %4242 = vmatpush3.bf16.msra.mxu1 %v4584_v22 }
 0x10a   :  { %4243 = vmatprep.subr.bf16.mxu1 %v4587_v25 }
 0x10b   :  { %4222 = vmatpush3.bf16.msra.mxu0 %v4586_v24 }
 0x10c   :  { %4223 = vmatprep.subr.bf16.mxu0 %v4589_v27 }
 0x10d   :  { %4244 = vmatpush3.bf16.msra.mxu1 %v4588_v26 }
 0x10e   :  { %4245 = vmatprep.subr.bf16.mxu1 %v4591_v29 }
 0x10f   :  { %4224 = vmatpush3.bf16.msra.mxu0 %v4590_v28 }
 0x110   :  { %4225 = vmatprep.subr.bf16.mxu0 %v4593_v31 }
 0x111   :  { %4246 = vmatpush3.bf16.msra.mxu1 %v4592_v30 }
 0x112   :  { %4247 = vmatprep.subr.bf16.mxu1 %v4595_v33 }
 0x113   :  { %4226 = vmatpush3.bf16.msra.mxu0 %v4594_v32 }
 0x114   :  { %4227 = vmatprep.subr.bf16.mxu0 %v4597_v35 }
 0x115   :  { %v3925_v40 = vpop.f32.mrb[4].mxu0  ;;  %4248 = vmatpush3.bf16.msra.mxu1 %v4596_v34 }
 0x116   :  { %v3926_v43 = vpop.f32.mrb[5].mxu0  ;;  %4249 = vmatprep.subr.bf16.mxu1 %v4599_v37 }
 0x117   :  { %v3927_v46 = vadd.f32 %v3926_v43, %v3925_v40  ;;  %v3928_v47 = vpop.f32.mrb[6].mxu0  ;;  %v3947_v48 = vpop.f32.mrb[4].mxu1  ;;  %4228 = vmatpush3.bf16.msra.mxu0 %v4598_v36 }
 0x118   :  { %v3929_v50 = vpop.f32.mrb[7].mxu0  ;;  %v3948_v51 = vpop.f32.mrb[5].mxu1  ;;  %4229 = vmatprep.subr.bf16.mxu0 %v4601_v39 }
 0x119   :  { %v2781_v54 = vadd.f32 %v3927_v46, %v5506_v11  ;;  %v3949_v55 = vadd.f32 %v3948_v51, %v3947_v48  ;;  %4250 = vmatpush3.bf16.msra.mxu1 %v4600_v38  ;;  %v3950_v58 = vpop.f32.mrb[6].mxu1 }
 0x11a   :  { %4251 = vmatprep.subr.bf16.mxu1 %v4603_v44  ;;  %v3951_v60 = vpop.f32.mrb[7].mxu1 }
 0x11b   :  { %v2821_v61 = vadd.f32 %v3949_v55, %v2781_v54  ;;  %4230 = vmatpush3.bf16.msra.mxu0 %v4602_v42 }
 0x11c   :  { %4231 = vmatprep.subr.bf16.mxu0 %v4605_v53 }
 0x11d   :  { %4252 = vmatpush3.bf16.msra.mxu1 %v4604_v52 }
 0x11e   :  { %4253 = vmatprep.subr.bf16.mxu1 %v4607_v59 }
 0x11f   :  { %4232 = vmatpush3.bf16.msra.mxu0 %v4606_v56 }
 0x120   :  { %4277 = vmatprep.subr.bf16.mxu0 %v4649_v3 }
 0x121   :  { %4254 = vmatpush3.bf16.msra.mxu1 %v4609_v63 }
 0x122   :  { %3339 = vmatmul.mubr.bf16.vlgmr.msra.gmra.mrb[32].mxu0 %v845_v0  ;;  %4293 = vmatprep.subr.bf16.mxu1 %v4649_v3 }
 0x123   :  { %10 = vsyncpa [#allocation3], 0  ;;  %4278 = vmatpush3.bf16.msra.mxu0 %v4610_v2  ;;  %v4611_v5 = vld [vmem:[%s5692_s1 + $0x908] sm:$0xff]   ;;  %vm4650_vm0 = vmmov 0   ;;  %v4612_v6 = vld [vmem:[%s5692_s1 + $0x910] sm:$0xff]   ;;  %v823_v8 = vcombine.high %v26_v45, %v26_v45  ;;  %vm2662_vm1 = vcmask 785408  }
 0x124   :  { %4289 = vmatprep.mubr.msk.bf16.mxu0 %vm4650_vm0, %v4649_v3  ;;  %3379 = vmatmul.mubr.bf16.vlgmr.msra.gmra.mrb[32].mxu1 %v860_v4  ;;  %v4613_v7 = vld [vmem:[%s5692_s1 + $0x918] sm:$0xff]   ;;  %v4614_v9 = vld [vmem:[%s5692_s1 + $0x920] sm:$0xff]   ;;  %v4615_v11 = vld [vmem:[%s5692_s1 + $0x928] sm:$0xff]   ;;  %vm3499_vm2 = vcmask 1043456   ;;  %vm3495_vm3 = vcmask 982016   ;;  %s4651_s28 = smov [#allocation2]  }
 0x125   :  { %4279 = vmatprep.subr.bf16.mxu0 %v4649_v3  ;;  %4309 = vmatprep.mubr.msk.bf16.mxu1 %vm4650_vm0, %v4649_v3  ;;  %v837_v10 = vrot.slane %v823_v8, %v4787_v41  ;;  %v4616_v36 = vld [vmem:[%s5694_s3] sm:$0xff]   ;;  %v4617_v43 = vld [vmem:[%s5694_s3 + $0x8] sm:$0xff]   ;;  %v4618_v49 = vld [vmem:[%s5694_s3 + $0x10] sm:$0xff]   ;;  %s3551_s29 = sshll.u32 %s4651_s28, 4  ;;  %vm3543_vm4 = vcmask 74752   ;;  %s3552_s29 = int_to_ptr.vmem [resolvable:$true] %s3551_s29 }
 0x126   :  { %4294 = vmatpush3.bf16.msra.mxu1 %v4616_v36  ;;  %v4619_v52 = vld [vmem:[%s5694_s3 + $0x18] sm:$0xff]   ;;  %v4620_v53 = vld [vmem:[%s5694_s3 + $0x20] sm:$0xff]   ;;  %v4621_v54 = vld [vmem:[%s5694_s3 + $0x28] sm:$0xff]   ;;  %s4624_s2 = scalar_lea.vmem %s3552_s29, 32  ;;  %p4629_p1 = scmp.lt.s32.totalorder %s3552_s29, %s3552_s29 }
 0x127   :  { %4280 = vmatpush3.bf16.msra.mxu0 %v4611_v5  ;;  %v852_v14 = vrot.slane %v837_v10, %v4787_v41  ;;  %4295 = vmatprep.subr.bf16.mxu1 %v4649_v3  ;;  %v4622_v55 = vld [vmem:[%s5694_s3 + $0x30] sm:$0xff]   ;;  %v4623_v56 = vld [vmem:[%s5694_s3 + $0x38] ss:$0 sps:$4 sm:$0xff]   ;;  %p4625_p0 = scmp.ne.s32.totalorder %s3552_s29, %s4624_s2  ;;  %p4630_p2 = scmp.lt.s32.totalorder %s4624_s2, %s4624_s2 }
 0x128   :  { %4281 = vmatprep.subr.bf16.mxu0 %v4649_v3  ;;  %v3501_v57 = vsel %vm3499_vm2, %v4623_v56, 0 }
 0x129   :  { %p4631_p3 = por %p4630_p2, %p4629_p1 }
 0x12a   :  { %4296 = vmatpush3.bf16.msra.mxu1 %v4617_v43 }
 0x12b   :  { %4282 = vmatpush3.bf16.msra.mxu0 %v4612_v6  ;;  %4297 = vmatprep.subr.bf16.mxu1 %v4649_v3  ;;  %p4632_p4 = pnand %p4631_p3, %p4625_p0 }
 0x12c   :  { %4283 = vmatprep.subr.bf16.mxu0 %v4649_v3 }
 0x12e   :  { %4298 = vmatpush3.bf16.msra.mxu1 %v4618_v49  ;;  %v3855_v49 = vld [vmem:[%s5695_s4] ss:$0 sm:$0xff] }
 0x12f   :  { %4284 = vmatpush3.bf16.msra.mxu0 %v4613_v7  ;;  %4299 = vmatprep.subr.bf16.mxu1 %v4649_v3 }
 0x130   :  { %4285 = vmatprep.subr.bf16.mxu0 %v4649_v3 }
 0x132   :  { %4300 = vmatpush3.bf16.msra.mxu1 %v4619_v52 }
 0x133   :  { %4286 = vmatpush3.bf16.msra.mxu0 %v4614_v9  ;;  %4301 = vmatprep.subr.bf16.mxu1 %v4649_v3 }
 0x134   :  { %4287 = vmatprep.subr.bf16.mxu0 %v4649_v3 }
 0x135   :  { %v3969_v12 = vpop.f32.mrb[8].mxu0 }
 0x136   :  { %v3970_v13 = vpop.f32.mrb[9].mxu0  ;;  %4302 = vmatpush3.bf16.msra.mxu1 %v4620_v53 }
 0x137   :  { %v3971_v15 = vadd.f32 %v3970_v13, %v3969_v12  ;;  %v3972_v16 = vpop.f32.mrb[10].mxu0  ;;  %v3991_v17 = vpop.f32.mrb[8].mxu1  ;;  %4288 = vmatpush3.bf16.msra.mxu0 %v4615_v11  ;;  %4303 = vmatprep.subr.bf16.mxu1 %v4649_v3 }
 0x138   :  { %v3973_v18 = vpop.f32.mrb[11].mxu0  ;;  %v3992_v19 = vpop.f32.mrb[9].mxu1 }
 0x139   :  { %v2861_v20 = vadd.f32 %v3971_v15, %v2821_v61  ;;  %v3993_v21 = vadd.f32 %v3992_v19, %v3991_v17  ;;  %v3994_v22 = vpop.f32.mrb[10].mxu1 }
 0x13a   :  { %4290 = vmatmul.mubr.msk.bf16.vlgmr.msra.gmra.mrb[36].mxu0 %vm2662_vm1, %v852_v14  ;;  %v3995_v23 = vpop.f32.mrb[11].mxu1  ;;  %4304 = vmatpush3.bf16.msra.mxu1 %v4621_v54 }
 0x13b   :  { %v2901_v24 = vadd.f32 %v3993_v21, %v2861_v20  ;;  %4305 = vmatprep.subr.bf16.mxu1 %v4649_v3 }
 0x13e   :  { %4306 = vmatpush3.bf16.msra.mxu1 %v4622_v55 }
 0x13f   :  { %4307 = vmatprep.subr.bf16.mxu1 %v4649_v3 }
 0x142   :  { %4308 = vmatpush3.bf16.msra.mxu1 %v3501_v57 }
 0x155   :  { %v4013_v25 = vpop.f32.mrb[12].mxu0 }
 0x156   :  { %v4014_v26 = vpop.f32.mrb[13].mxu0 }
 0x157   :  { %v4015_v27 = vadd.f32 %v4014_v26, %v4013_v25  ;;  %v4016_v28 = vpop.f32.mrb[14].mxu0  ;;  %v4035_v29 = vpop.f32.mrb[12].mxu1 }
 0x158   :  { %v4017_v30 = vpop.f32.mrb[15].mxu0  ;;  %v4036_v41 = vpop.f32.mrb[13].mxu1 }
 0x159   :  { %v2941_v31 = vadd.f32 %v4015_v27, %v2901_v24  ;;  %v4037_v32 = vadd.f32 %v4036_v41, %v4035_v29  ;;  %v4038_v33 = vpop.f32.mrb[14].mxu1 }
 0x15a   :  { %v4039_v34 = vpop.f32.mrb[15].mxu1 }
 0x15b   :  { %v2981_v35 = vadd.f32 %v4037_v32, %v2941_v31 }
 0x175   :  { %v4057_v37 = vpop.f32.mrb[16].mxu0 }
 0x176   :  { %v4058_v38 = vpop.f32.mrb[17].mxu0 }
 0x177   :  { %v4059_v39 = vadd.f32 %v4058_v38, %v4057_v37  ;;  %v4060_v40 = vpop.f32.mrb[18].mxu0  ;;  %v4079_v42 = vpop.f32.mrb[16].mxu1 }
 0x178   :  { %v4061_v44 = vpop.f32.mrb[19].mxu0  ;;  %v4080_v45 = vpop.f32.mrb[17].mxu1 }
 0x179   :  { %v3021_v46 = vadd.f32 %v4059_v39, %v2981_v35  ;;  %v4081_v47 = vadd.f32 %v4080_v45, %v4079_v42  ;;  %v4082_v48 = vpop.f32.mrb[18].mxu1 }
 0x17a   :  { %v4083_v50 = vpop.f32.mrb[19].mxu1 }
 0x17b   :  { %v3061_v51 = vadd.f32 %v4081_v47, %v3021_v46 }
 0x195   :  { %v4101_v58 = vpop.f32.mrb[20].mxu0 }
 0x196   :  { %v4102_v59 = vpop.f32.mrb[21].mxu0 }
 0x197   :  { %v4103_v60 = vadd.f32 %v4102_v59, %v4101_v58  ;;  %v4104_v61 = vpop.f32.mrb[22].mxu0  ;;  %v4123_v62 = vpop.f32.mrb[20].mxu1 }
 0x198   :  { %v4105_v63 = vpop.f32.mrb[23].mxu0  ;;  %v4124_v0 = vpop.f32.mrb[21].mxu1 }
 0x199   :  { %v3101_v1 = vadd.f32 %v4103_v60, %v3061_v51  ;;  %v4125_v2 = vadd.f32 %v4124_v0, %v4123_v62  ;;  %v4126_v4 = vpop.f32.mrb[22].mxu1 }
 0x19a   :  { %v4127_v5 = vpop.f32.mrb[23].mxu1 }
 0x19b   :  { %v3141_v6 = vadd.f32 %v4125_v2, %v3101_v1 }
 0x1b5   :  { %v4145_v3 = vpop.f32.mrb[24].mxu0 }
 0x1b6   :  { %v4146_v7 = vpop.f32.mrb[25].mxu0 }
 0x1b7   :  { %v4147_v8 = vadd.f32 %v4146_v7, %v4145_v3  ;;  %v4148_v9 = vpop.f32.mrb[26].mxu0  ;;  %v4167_v10 = vpop.f32.mrb[24].mxu1 }
 0x1b8   :  { %v4149_v11 = vpop.f32.mrb[27].mxu0  ;;  %v4168_v12 = vpop.f32.mrb[25].mxu1 }
 0x1b9   :  { %v3181_v13 = vadd.f32 %v4147_v8, %v3141_v6  ;;  %v4169_v14 = vadd.f32 %v4168_v12, %v4167_v10  ;;  %v4170_v15 = vpop.f32.mrb[26].mxu1 }
 0x1ba   :  { %v4171_v16 = vpop.f32.mrb[27].mxu1 }
 0x1bb   :  { %v3221_v17 = vadd.f32 %v4169_v14, %v3181_v13 }
 0x1d5   :  { %v4189_v18 = vpop.f32.mrb[28].mxu0 }
 0x1d6   :  { %v4190_v19 = vpop.f32.mrb[29].mxu0 }
 0x1d7   :  { %v4191_v20 = vadd.f32 %v4190_v19, %v4189_v18  ;;  %v4192_v21 = vpop.f32.mrb[30].mxu0  ;;  %v4211_v22 = vpop.f32.mrb[28].mxu1 }
 0x1d8   :  { %v4193_v23 = vpop.f32.mrb[31].mxu0  ;;  %v4212_v24 = vpop.f32.mrb[29].mxu1 }
 0x1d9   :  { %v3261_v25 = vadd.f32 %v4191_v20, %v3221_v17  ;;  %v4213_v26 = vadd.f32 %v4212_v24, %v4211_v22  ;;  %v4214_v27 = vpop.f32.mrb[30].mxu1 }
 0x1da   :  { %v4215_v28 = vpop.f32.mrb[31].mxu1 }
 0x1db   :  { %v3301_v29 = vadd.f32 %v4213_v26, %v3261_v25 }
 0x1f5   :  { %v4233_v30 = vpop.f32.mrb[32].mxu0 }
 0x1f6   :  { %v4234_v41 = vpop.f32.mrb[33].mxu0 }
 0x1f7   :  { %v4235_v31 = vadd.f32 %v4234_v41, %v4233_v30  ;;  %v4236_v32 = vpop.f32.mrb[34].mxu0  ;;  %v4255_v33 = vpop.f32.mrb[32].mxu1 }
 0x1f8   :  { %v4237_v34 = vpop.f32.mrb[35].mxu0  ;;  %v4256_v35 = vpop.f32.mrb[33].mxu1 }
 0x1f9   :  { %v3341_v36 = vadd.f32 %v4235_v31, %v3301_v29  ;;  %v4257_v37 = vadd.f32 %v4256_v35, %v4255_v33  ;;  %v4258_v38 = vpop.f32.mrb[34].mxu1 }
 0x1fa   :  { %v4259_v39 = vpop.f32.mrb[35].mxu1 }
 0x1fb   :  { %v3381_v40 = vadd.f32 %v4257_v37, %v3341_v36 }
 0x20d   :  { %v3420_v42 = vpop.f32.mrb[36].mxu0 }
 0x20e   :  { %v3421_v43 = vadd.f32 %v3420_v42, %v3381_v40  ;;  %v4291_v44 = vpop.f32.mrb[37].mxu0 }
 0x20f   :  { %v3423_v45 = vpop.f32.mrb[38].mxu0 }
 0x210   :  { %v3426_v46 = vmax.f32 %v3421_v43, 0.0  ;;  %v4292_v47 = vpop.f32.mrb[39].mxu0 }
 0x212   :  { %v3427_v48 = vpack.c.bf16 %v3426_v46, %v3426_v46 }
 0x214   :  { %4310 = vmatmul.mubr.msk.bf16.vlgmr.msra.gmra.mrb[36].mxu1 %vm3495_vm3, %v3427_v48 }
 0x2e7   :  { %v3537_v50 = vpop.f32.mrb[36].mxu1 }
 0x2e8   :  { %v3538_v51 = vadd.f32 %v3855_v49, %v3537_v50  ;;  %v4311_v52 = vpop.f32.mrb[37].mxu1 }
 0x2e9   :  { %v3540_v53 = vpop.f32.mrb[38].mxu1 }
 0x2ea   :  { %v4312_v54 = vpop.f32.mrb[39].mxu1  ;;  %3544 = vst.msk [vmem:[#allocation2] sm:$0x3] %vm3543_vm4, %v3538_v51 }
 0x2eb   :  { %4635 = shalt.err (!%p4632_p4)
}
 0x2ec   :  { %s4636_s4 = scalar_lea.hbm %s5696_s5, 32 }
 0x2ed   :  { %p4637_p5 = scmp.ne.s32.totalorder %s5696_s5, %s4636_s4  ;;  %p4640_p6 = scmp.lt.u32.totalorder %s4636_s4, %s5696_s5 }
 0x2ef   :  { %p4642_p7 = pnand %p4640_p6, %p4637_p5 }
 0x2f1   :  { %4645 = shalt.err (!%p4642_p7)
}
 0x2f2   :  { %3554 = dma.vmem_to_hbm [thread:$0]  %s3552_s29, 32, %s5696_s5, [#allocation3]  }
 0x2f3   :  { %4646 = dma.done.wait [#allocation3], 32  }
 0x2f4   :  { %4647 = vsyncadd [#allocation3], 4294967264 }
 0x2f5   :  { %3558 = vsyncpa [#allocation3], 1 }

</bundles_post_ra>
